<compile_context>
chip_gen: v5e
topology: v5e:2x2
jax: 0.10.0
libtpu: 0.0.40
codegen_flags: <defaults>
</compile_context>

<pallas_src>
import math
import jax
import jax.numpy as jnp
from jax import lax
from jax.experimental import pallas as pl
from jax.experimental.pallas import tpu as pltpu


def _round_up(x, m):
    return ((x + m - 1) // m) * m


def _vmem_budget_bytes():
    """Per-generation VMEM budget: ~75% of physical, capped at 96 MiB.

    v7x (64 MiB physical) -> 48 MiB; v5e/v6e (128 MiB) -> 96 MiB.
    """
    cap = 64 * 1024 * 1024
    try:
        cap = int(getattr(pltpu.get_tpu_info(), "vmem_capacity_bytes", cap))
    except Exception:
        pass
    return min((cap * 3) // 4, 96 * 1024 * 1024)


def _fused_vmem_bytes(Mp, H, tv, cd_bytes, out_bytes):
    """Conservative fused-kernel footprint (constant-index blocks counted as
    double-buffered; pipeline_mode=pl.Buffered(1) could reclaim a few MB)."""
    x = 2 * Mp * H * cd_bytes          # gathered masked rows (constant block)
    w = 2 * H * H * cd_bytes           # dense weight
    row_vecs = 2 * 3 * H * 4           # dense bias, LN gamma, LN beta
    eT = 2 * H * tv * cd_bytes         # embedding-table vocab tile (streamed)
    vb = 2 * tv * 4                    # decoder bias tile
    out = 2 * Mp * tv * out_bytes      # logits tile
    h = Mp * H * cd_bytes              # resident transformed-h scratch
    return x + w + row_vecs + eT + vb + out + h


# ----------------------------------------------------------------------------
# Fused kernel: (dense + bias-gelu(tanh) + LayerNorm) -> resident h scratch,
# then decoder projection of one vocab tile: logits = h @ E^T[:, tile] + bias.
# ----------------------------------------------------------------------------
def fused_head_kernel(x_ref, wT_ref, db_ref, g_ref, be_ref, eT_ref, vb_ref,
                      o_ref, h_ref):
    # Transform runs once per core split (first vocab step); h stays in VMEM.
    @pl.when(pl.program_id(1) == 0)
    def _():
        z = jnp.dot(x_ref[...], wT_ref[...], preferred_element_type=jnp.float32)
        z = z + db_ref[...]                                 # (1, H) f32 broadcast
        # bias_gelu from the PyTorch module (tanh approximation), in f32
        h = z * 0.5 * (1.0 + jnp.tanh(0.79788456 * z * (1.0 + 0.044715 * z * z)))
        # LayerNorm over last dim, eps = 1e-5; two-pass variance (matches ref)
        mu = jnp.mean(h, axis=-1, keepdims=True)
        var = jnp.mean((h - mu) * (h - mu), axis=-1, keepdims=True)
        normed = (h - mu) * lax.rsqrt(var + 1e-5)
        h_ref[...] = (g_ref[...] * normed + be_ref[...]).astype(h_ref.dtype)

    # Decoder: one vocab tile of logits, f32 accumulation on the MXU.
    acc = jnp.dot(h_ref[...], eT_ref[...], preferred_element_type=jnp.float32)
    o_ref[...] = (acc + vb_ref[...]).astype(o_ref.dtype)


# ----------------------------------------------------------------------------
# One-time parameter prep (outside the traced forward): transposes, vocab
# padding to the tile size, dtype casts. Torch layouts in, kernel layouts out.
# ----------------------------------------------------------------------------
def prepare_params(params, *, compute_dtype=jnp.bfloat16,
                   out_dtype=jnp.float32, tv=2048):
    H = params["dense_w"].shape[0]
    V = params["emb_w"].shape[0]

    # Snap tv to a power-of-two multiple of 128 (<= round_up(V, 128)) so that
    # later halving (for VMEM fit at call time) always keeps Vp % tv == 0.
    tv = max(128, min(int(tv), _round_up(V, 128)))
    snapped = 128
    while snapped * 2 <= tv:
        snapped *= 2
    tv = snapped

    Vp = _round_up(V, tv)
    # Make the vocab-tile count even (at most one extra zero tile) so the
    # leading "parallel" grid axis can feed both v7x TensorCores.
    if (Vp // tv) > 1 and (Vp // tv) % 2 == 1:
        Vp += tv

    emb = params["emb_w"]
    dec_bias = params["dec_bias"]
    if Vp != V:
        emb = jnp.pad(emb, ((0, Vp - V), (0, 0)))
        dec_bias = jnp.pad(dec_bias, (0, Vp - V))

    return {
        "wT": params["dense_w"].T.astype(compute_dtype),          # [H_in, H_out]
        "dense_b": params["dense_b"].reshape(1, H).astype(jnp.float32),
        "ln_gamma": params["ln_gamma"].reshape(1, H).astype(jnp.float32),
        "ln_beta": params["ln_beta"].reshape(1, H).astype(jnp.float32),
        "eT": emb.T.astype(compute_dtype),                        # [H, Vp]
        "dec_bias": dec_bias.reshape(1, Vp).astype(jnp.float32),
        "vocab_size": V,
        "tv": tv,
        "compute_dtype": compute_dtype,
        "out_dtype": out_dtype,
        "vmem_budget": _vmem_budget_bytes(),
    }


# ----------------------------------------------------------------------------
# Full BertLMPredictionHead forward
# ----------------------------------------------------------------------------
def bert_lm_prediction_head(hidden_states, masked_token_indexes, prepped):
    """hidden_states: [B, S, H]; masked_token_indexes: [M] int32 or None."""
    B, S, H = hidden_states.shape
    cd = prepped["compute_dtype"]
    out_dtype = prepped["out_dtype"]
    x = hidden_states.reshape(B * S, H)

    # Gather masked rows BEFORE the transform (both are per-row ops, so this
    # is exactly equivalent to transform-then-index_select but skips the
    # dense+gelu+LN work and HBM traffic on unmasked rows).
    # TODO(synk): fold this gather into the kernel via scalar-prefetch DMA to
    # also remove the small gathered-x HBM roundtrip.
    if masked_token_indexes is not None:
        x = jnp.take(x, masked_token_indexes, axis=0)
    rows = x.shape[0]

    # Bounded row padding: multiple of 128 (zero rows -> finite garbage,
    # sliced off below), never up to a 512-row tile.
    Mp = _round_up(max(rows, 1), 128)
    x = x.astype(cd)
    if Mp != rows:
        x = jnp.pad(x, ((0, Mp - rows), (0, 0)))

    Vp = prepped["eT"].shape[1]
    budget = prepped["vmem_budget"]
    cd_bytes = jnp.dtype(cd).itemsize
    out_bytes = jnp.dtype(out_dtype).itemsize

    # Largest vocab tile (<= prepared tv) whose fused footprint fits the
    # per-generation VMEM budget; halving preserves Vp % tv == 0 and an even
    # tile count.
    tv = prepped["tv"]
    while tv > 128 and _fused_vmem_bytes(Mp, H, tv, cd_bytes, out_bytes) > budget:
        tv //= 2
    nv = Vp // tv
    # Leading "parallel" axis splits the vocab range across the two v7x
    # TensorCores (no-op on single-core v5e/v6e); the inner vocab axis must be
    # "arbitrary" because every split recomputes h into scratch at step 0.
    ncs = 2 if (nv % 2 == 0 and nv >= 2) else 1
    nv_per = nv // ncs

    vmap = lambda c, j: (0, c * nv_per + j)
    const = lambda c, j: (0, 0)

    logits = pl.pallas_call(
        fused_head_kernel,
        out_shape=jax.ShapeDtypeStruct((Mp, Vp), out_dtype),
        grid_spec=pltpu.PrefetchScalarGridSpec(
            num_scalar_prefetch=0,
            grid=(ncs, nv_per),
            in_specs=[
                pl.BlockSpec((Mp, H), const),   # x: masked rows, fetched once
                pl.BlockSpec((H, H), const),    # dense W^T, fetched once
                pl.BlockSpec((1, H), const),    # dense bias
                pl.BlockSpec((1, H), const),    # LN gamma
                pl.BlockSpec((1, H), const),    # LN beta
                pl.BlockSpec((H, tv), vmap),    # E^T tile: streamed from HBM once
                pl.BlockSpec((1, tv), vmap),    # decoder bias tile
            ],
            out_specs=pl.BlockSpec((Mp, tv), vmap),
            scratch_shapes=[pltpu.VMEM((Mp, H), cd)],   # resident transformed h
        ),
        compiler_params=pltpu.CompilerParams(
            dimension_semantics=("parallel", "arbitrary"),
            vmem_limit_bytes=budget),
    )(x, prepped["wT"], prepped["dense_b"], prepped["ln_gamma"],
      prepped["ln_beta"], prepped["eT"], prepped["dec_bias"])

    return logits[:rows, :prepped["vocab_size"]]


# ----------------------------------------------------------------------------
# Pure-JAX f32 reference (mirrors the PyTorch module exactly)
# ----------------------------------------------------------------------------
def reference(hidden_states, masked_token_indexes, params):
    B, S, H = hidden_states.shape
    x = hidden_states.reshape(B * S, H).astype(jnp.float32)
    z = x @ params["dense_w"].T + params["dense_b"]
    h = z * 0.5 * (1.0 + jnp.tanh(0.79788456 * z * (1.0 + 0.044715 * z * z)))
    mu = jnp.mean(h, axis=-1, keepdims=True)
    var = jnp.mean((h - mu) ** 2, axis=-1, keepdims=True)
    h = params["ln_gamma"] * ((h - mu) / jnp.sqrt(var + 1e-5)) + params["ln_beta"]
    if masked_token_indexes is not None:
        h = jnp.take(h, masked_token_indexes, axis=0)
    return h @ params["emb_w"].T + params["dec_bias"]


if __name__ == "__main__":
    B, S, H, V = 2, 8, 32, 512
    M = 8  # number of masked tokens

    key = jax.random.PRNGKey(0)
    k_x, k_w, k_b, k_e = jax.random.split(key, 4)

    bound = 1.0 / math.sqrt(H)
    params = {
        # LinearActivation(hidden, hidden): weight [out, in], bias [out]
        "dense_w": jax.random.uniform(k_w, (H, H), jnp.float32, -bound, bound),
        "dense_b": jax.random.uniform(k_b, (H,), jnp.float32, -bound, bound),
        # BertLayerNorm(hidden, eps=1e-5): gamma ones, beta zeros
        "ln_gamma": jnp.ones((H,), jnp.float32),
        "ln_beta": jnp.zeros((H,), jnp.float32),
        # Tied embedding weights [vocab, hidden]
        "emb_w": jax.random.normal(k_e, (V, H), jnp.float32) * 0.02,
        # decoder bias initialized to zeros in the module
        "dec_bias": jnp.zeros((V,), jnp.float32),
    }

    hidden_states = jax.random.normal(k_x, (B, S, H), jnp.float32)
    masked_token_indexes = jnp.array([0, 3, 5, 7, 9, 11, 13, 15], jnp.int32)

    ref = reference(hidden_states, masked_token_indexes, params)

    # --- f32 compute + f32 logits: tight correctness check ------------------
    prepped_f32 = prepare_params(params, compute_dtype=jnp.float32,
                                 out_dtype=jnp.float32)
    fwd_f32 = jax.jit(lambda hs, idx: bert_lm_prediction_head(hs, idx, prepped_f32))
    out_f32 = jax.block_until_ready(fwd_f32(hidden_states, masked_token_indexes))
    assert out_f32.shape == (M, V), out_f32.shape
    assert jnp.allclose(out_f32, ref, atol=1e-3, rtol=1e-3), \
        float(jnp.max(jnp.abs(out_f32 - ref)))

    # --- production path: bf16 compute + bf16 logits (halves writeback) -----
    prepped_bf16 = prepare_params(params, compute_dtype=jnp.bfloat16,
                                  out_dtype=jnp.bfloat16)
    fwd_bf16 = jax.jit(lambda hs, idx: bert_lm_prediction_head(hs, idx, prepped_bf16))
    out_bf16 = jax.block_until_ready(fwd_bf16(hidden_states, masked_token_indexes))
    assert out_bf16.shape == (M, V), out_bf16.shape
    assert out_bf16.dtype == jnp.bfloat16, out_bf16.dtype
    assert jnp.allclose(out_bf16.astype(jnp.float32), ref, atol=3e-2, rtol=3e-2), \
        float(jnp.max(jnp.abs(out_bf16.astype(jnp.float32) - ref)))

    print("KERNEL_OK")
</pallas_src>

<mosaic_0001>
module attributes {stable_mosaic.version = 11 : i64} {
  func.func @fused_head_kernel(%arg0: i32, %arg1: i32, %arg2: memref<128x32xf32, #tpu.memory_space<vmem>>, %arg3: memref<32x32xf32, #tpu.memory_space<vmem>>, %arg4: memref<1x32xf32, #tpu.memory_space<vmem>>, %arg5: memref<1x32xf32, #tpu.memory_space<vmem>>, %arg6: memref<1x32xf32, #tpu.memory_space<vmem>>, %arg7: memref<32x512xf32, #tpu.memory_space<vmem>>, %arg8: memref<1x512xf32, #tpu.memory_space<vmem>>, %arg9: memref<128x512xf32, #tpu.memory_space<vmem>>, %arg10: memref<128x32xf32, #tpu.memory_space<vmem>>) attributes {dimension_semantics = [#tpu.dimension_semantics<parallel>, #tpu.dimension_semantics<arbitrary>], iteration_bounds = array<i64: 1, 1>, scalar_prefetch = 0 : i64, scratch_operands = 1 : i64, tpu.core_type = #tpu.core_type<tc>, window_params = [{pipeline_mode = #tpu.pipeline_mode<synchronous>, transform_indices = @transform_0, window_bounds = array<i64: 128, 32>}, {pipeline_mode = #tpu.pipeline_mode<synchronous>, transform_indices = @transform_1, window_bounds = array<i64: 32, 32>}, {pipeline_mode = #tpu.pipeline_mode<synchronous>, transform_indices = @transform_2, window_bounds = array<i64: 1, 32>}, {pipeline_mode = #tpu.pipeline_mode<synchronous>, transform_indices = @transform_3, window_bounds = array<i64: 1, 32>}, {pipeline_mode = #tpu.pipeline_mode<synchronous>, transform_indices = @transform_4, window_bounds = array<i64: 1, 32>}, {transform_indices = @transform_5, window_bounds = array<i64: 32, 512>}, {transform_indices = @transform_6, window_bounds = array<i64: 1, 512>}, {transform_indices = @transform_7, window_bounds = array<i64: 128, 512>}]} {
    %c0_i32 = arith.constant 0 : i32
    %0 = arith.cmpi eq, %arg1, %c0_i32 : i32
    %1 = arith.extui %0 : i1 to i32
    %c0_i32_0 = arith.constant 0 : i32
    %2 = arith.cmpi ne, %1, %c0_i32_0 : i32
    scf.if %2 {
      %c0_8 = arith.constant 0 : index
      %c0_9 = arith.constant 0 : index
      %10 = vector.load %arg2[%c0_8, %c0_9] : memref<128x32xf32, #tpu.memory_space<vmem>>, vector<128x32xf32>
      %c0_10 = arith.constant 0 : index
      %c0_11 = arith.constant 0 : index
      %11 = vector.load %arg3[%c0_10, %c0_11] : memref<32x32xf32, #tpu.memory_space<vmem>>, vector<32x32xf32>
      %cst_12 = arith.constant dense<0.000000e+00> : vector<128x32xf32>
      %12 = tpu.matmul %10, %11, %cst_12 {dimension_numbers = #tpu.dot_dimension_numbers<[1], [0], [0], [1], [0, 0, 1, 1], [], []>} : vector<128x32xf32>, vector<32x32xf32>, vector<128x32xf32> -> vector<128x32xf32>
      %c0_13 = arith.constant 0 : index
      %c0_14 = arith.constant 0 : index
      %13 = vector.load %arg4[%c0_13, %c0_14] : memref<1x32xf32, #tpu.memory_space<vmem>>, vector<1x32xf32>
      %14 = vector.broadcast %13 : vector<1x32xf32> to vector<128x32xf32>
      %15 = arith.addf %12, %14 : vector<128x32xf32>
      %cst_15 = arith.constant 5.000000e-01 : f32
      %16 = vector.broadcast %cst_15 : f32 to vector<128x32xf32>
      %17 = arith.mulf %15, %16 : vector<128x32xf32>
      %cst_16 = arith.constant 0.797884583 : f32
      %18 = vector.broadcast %cst_16 : f32 to vector<128x32xf32>
      %19 = arith.mulf %18, %15 : vector<128x32xf32>
      %cst_17 = arith.constant 4.471500e-02 : f32
      %20 = vector.broadcast %cst_17 : f32 to vector<128x32xf32>
      %21 = arith.mulf %20, %15 : vector<128x32xf32>
      %22 = arith.mulf %21, %15 : vector<128x32xf32>
      %cst_18 = arith.constant 1.000000e+00 : f32
      %23 = vector.broadcast %cst_18 : f32 to vector<128x32xf32>
      %24 = arith.addf %23, %22 : vector<128x32xf32>
      %25 = arith.mulf %19, %24 : vector<128x32xf32>
      %26 = math.tanh %25 : vector<128x32xf32>
      %cst_19 = arith.constant 1.000000e+00 : f32
      %27 = vector.broadcast %cst_19 : f32 to vector<128x32xf32>
      %28 = arith.addf %27, %26 : vector<128x32xf32>
      %29 = arith.mulf %17, %28 : vector<128x32xf32>
      %cst_20 = arith.constant dense<0.000000e+00> : vector<128xf32>
      %30 = vector.multi_reduction <add>, %29, %cst_20 [1] : vector<128x32xf32> to vector<128xf32>
      %31 = vector.shape_cast %30 : vector<128xf32> to vector<128x1xf32>
      %cst_21 = arith.constant 3.200000e+01 : f32
      %32 = vector.broadcast %cst_21 : f32 to vector<128x1xf32>
      %33 = arith.divf %31, %32 : vector<128x1xf32>
      %34 = vector.broadcast %33 : vector<128x1xf32> to vector<128x32xf32>
      %35 = arith.subf %29, %34 : vector<128x32xf32>
      %36 = vector.broadcast %33 : vector<128x1xf32> to vector<128x32xf32>
      %37 = arith.subf %29, %36 : vector<128x32xf32>
      %38 = arith.mulf %35, %37 : vector<128x32xf32>
      %cst_22 = arith.constant dense<0.000000e+00> : vector<128xf32>
      %39 = vector.multi_reduction <add>, %38, %cst_22 [1] : vector<128x32xf32> to vector<128xf32>
      %40 = vector.shape_cast %39 : vector<128xf32> to vector<128x1xf32>
      %cst_23 = arith.constant 3.200000e+01 : f32
      %41 = vector.broadcast %cst_23 : f32 to vector<128x1xf32>
      %42 = arith.divf %40, %41 : vector<128x1xf32>
      %43 = vector.broadcast %33 : vector<128x1xf32> to vector<128x32xf32>
      %44 = arith.subf %29, %43 : vector<128x32xf32>
      %cst_24 = arith.constant 9.99999974E-6 : f32
      %45 = vector.broadcast %cst_24 : f32 to vector<128x1xf32>
      %46 = arith.addf %42, %45 : vector<128x1xf32>
      %47 = math.rsqrt %46 : vector<128x1xf32>
      %48 = vector.broadcast %47 : vector<128x1xf32> to vector<128x32xf32>
      %49 = arith.mulf %44, %48 : vector<128x32xf32>
      %c0_25 = arith.constant 0 : index
      %c0_26 = arith.constant 0 : index
      %50 = vector.load %arg5[%c0_25, %c0_26] : memref<1x32xf32, #tpu.memory_space<vmem>>, vector<1x32xf32>
      %51 = vector.broadcast %50 : vector<1x32xf32> to vector<128x32xf32>
      %52 = arith.mulf %51, %49 : vector<128x32xf32>
      %c0_27 = arith.constant 0 : index
      %c0_28 = arith.constant 0 : index
      %53 = vector.load %arg6[%c0_27, %c0_28] : memref<1x32xf32, #tpu.memory_space<vmem>>, vector<1x32xf32>
      %54 = vector.broadcast %53 : vector<1x32xf32> to vector<128x32xf32>
      %55 = arith.addf %52, %54 : vector<128x32xf32>
      %c0_29 = arith.constant 0 : index
      %c0_30 = arith.constant 0 : index
      %56 = vector.load %arg10[%c0_29, %c0_30] : memref<128x32xf32, #tpu.memory_space<vmem>>, vector<128x32xf32>
      tpu.vector_store %arg10[%c0_29, %c0_30], %55 {strides = array<i32>} : memref<128x32xf32, #tpu.memory_space<vmem>>, vector<128x32xf32>,
    } else {
    }
    %c0 = arith.constant 0 : index
    %c0_1 = arith.constant 0 : index
    %3 = vector.load %arg10[%c0, %c0_1] : memref<128x32xf32, #tpu.memory_space<vmem>>, vector<128x32xf32>
    %c0_2 = arith.constant 0 : index
    %c0_3 = arith.constant 0 : index
    %4 = vector.load %arg7[%c0_2, %c0_3] : memref<32x512xf32, #tpu.memory_space<vmem>>, vector<32x512xf32>
    %cst = arith.constant dense<0.000000e+00> : vector<128x512xf32>
    %5 = tpu.matmul %3, %4, %cst {dimension_numbers = #tpu.dot_dimension_numbers<[1], [0], [0], [1], [0, 0, 1, 1], [], []>} : vector<128x32xf32>, vector<32x512xf32>, vector<128x512xf32> -> vector<128x512xf32>
    %c0_4 = arith.constant 0 : index
    %c0_5 = arith.constant 0 : index
    %6 = vector.load %arg8[%c0_4, %c0_5] : memref<1x512xf32, #tpu.memory_space<vmem>>, vector<1x512xf32>
    %7 = vector.broadcast %6 : vector<1x512xf32> to vector<128x512xf32>
    %8 = arith.addf %5, %7 : vector<128x512xf32>
    %c0_6 = arith.constant 0 : index
    %c0_7 = arith.constant 0 : index
    %9 = vector.load %arg9[%c0_6, %c0_7] : memref<128x512xf32, #tpu.memory_space<vmem>>, vector<128x512xf32>
    tpu.vector_store %arg9[%c0_6, %c0_7], %8 {strides = array<i32>} : memref<128x512xf32, #tpu.memory_space<vmem>>, vector<128x512xf32>,
    return
  }
  func.func @transform_0(%arg0: i32, %arg1: i32) -> (i32, i32) {
    %c0_i32 = arith.constant 0 : i32
    %c0_i32_0 = arith.constant 0 : i32
    %c0_i32_1 = arith.constant 0 : i32
    return %c0_i32, %c0_i32_0 : i32, i32
  }
  func.func @transform_1(%arg0: i32, %arg1: i32) -> (i32, i32) {
    %c0_i32 = arith.constant 0 : i32
    %c0_i32_0 = arith.constant 0 : i32
    %c0_i32_1 = arith.constant 0 : i32
    return %c0_i32, %c0_i32_0 : i32, i32
  }
  func.func @transform_2(%arg0: i32, %arg1: i32) -> (i32, i32) {
    %c0_i32 = arith.constant 0 : i32
    %c0_i32_0 = arith.constant 0 : i32
    %c0_i32_1 = arith.constant 0 : i32
    return %c0_i32, %c0_i32_0 : i32, i32
  }
  func.func @transform_3(%arg0: i32, %arg1: i32) -> (i32, i32) {
    %c0_i32 = arith.constant 0 : i32
    %c0_i32_0 = arith.constant 0 : i32
    %c0_i32_1 = arith.constant 0 : i32
    return %c0_i32, %c0_i32_0 : i32, i32
  }
  func.func @transform_4(%arg0: i32, %arg1: i32) -> (i32, i32) {
    %c0_i32 = arith.constant 0 : i32
    %c0_i32_0 = arith.constant 0 : i32
    %c0_i32_1 = arith.constant 0 : i32
    return %c0_i32, %c0_i32_0 : i32, i32
  }
  func.func @transform_5(%arg0: i32, %arg1: i32) -> (i32, i32) {
    %c1_i32 = arith.constant 1 : i32
    %0 = arith.muli %arg0, %c1_i32 : i32
    %1 = arith.addi %0, %arg1 : i32
    %c0_i32 = arith.constant 0 : i32
    %c0_i32_0 = arith.constant 0 : i32
    return %c0_i32, %1 : i32, i32
  }
  func.func @transform_6(%arg0: i32, %arg1: i32) -> (i32, i32) {
    %c1_i32 = arith.constant 1 : i32
    %0 = arith.muli %arg0, %c1_i32 : i32
    %1 = arith.addi %0, %arg1 : i32
    %c0_i32 = arith.constant 0 : i32
    %c0_i32_0 = arith.constant 0 : i32
    return %c0_i32, %1 : i32, i32
  }
  func.func @transform_7(%arg0: i32, %arg1: i32) -> (i32, i32) {
    %c1_i32 = arith.constant 1 : i32
    %0 = arith.muli %arg0, %c1_i32 : i32
    %1 = arith.addi %0, %arg1 : i32
    %c0_i32 = arith.constant 0 : i32
    %c0_i32_0 = arith.constant 0 : i32
    return %c0_i32, %1 : i32, i32
  }
}

</mosaic_0001>

<bundles_post_ra>
// kernel: _lambda_.1
= control target key start
LH: loop header
LB: loop body
LE: loop exit
PB: predicated region body
PF: predicated region fallthrough
CT: control target
= control target key end

     0   :  { %vm109_vm0 = vcmask 261120   ;;  %s2278_s1 = inlined_call_operand.vmem [shape: f32[32,32], index: 1, kind: input, shape index: {}]   ;;  %s2279_s0 = inlined_call_operand.vmem [shape: f32[128,32], index: 0, kind: input, shape index: {}]   ;;  %s2280_s2 = inlined_call_operand.vmem [shape: f32[1,32], index: 2, kind: input, shape index: {}]   ;;  %s2281_s3 = inlined_call_operand.vmem [shape: f32[1,32], index: 3, kind: input, shape index: {}]   ;;  %s2282_s4 = inlined_call_operand.vmem [shape: f32[1,32], index: 4, kind: input, shape index: {}]   ;;  %s2283_s5 = inlined_call_operand.vmem [shape: f32[32,512], index: 5, kind: input, shape index: {}]   ;;  %s2284_s6 = inlined_call_operand.vmem [shape: f32[1,512], index: 6, kind: input, shape index: {}]   ;;  %s2285_s7 = inlined_call_operand.vmem [shape: f32[128,512], index: 7, kind: output, shape index: {}]  }
   0x1   :  { %v104_v0 = vld [vmem:[%s2278_s1 + $0x18] sm:$0xff]  ;;  %v103_v1 = vld [vmem:[%s2278_s1 + $0x10] sm:$0xff]  ;;  %v102_v2 = vld [vmem:[%s2278_s1 + $0x8] sm:$0xff] }
   0x2   :  { %170 = vmatpush.msra.mxu0 %v104_v0  ;;  %1312 = vmatpush.msra.mxu1 %v104_v0  ;;  %v101_v3 = vld [vmem:[%s2278_s1] sm:$0xff]  ;;  %v86_v7 = vld [vmem:[%s2279_s0 + $0x8] sm:$0xff]  ;;  %v87_v9 = vld [vmem:[%s2279_s0 + $0x10] sm:$0xff] }
   0x3   :  { %1313 = vmatpush.msra.mxu2 %v104_v0  ;;  %1314 = vmatpush.msra.mxu3 %v104_v0  ;;  %v85_v4 = vld [vmem:[%s2279_s0] sm:$0xff]  ;;  %v90_v8 = vld [vmem:[%s2279_s0 + $0x28] sm:$0xff]  ;;  %v91_v10 = vld [vmem:[%s2279_s0 + $0x30] sm:$0xff] }
   0x4   :  { %171 = vmatpush.msra.mxu0 %v103_v1  ;;  %1315 = vmatpush.msra.mxu1 %v103_v1  ;;  %v89_v5 = vld [vmem:[%s2279_s0 + $0x20] sm:$0xff]  ;;  %v88_v11 = vld [vmem:[%s2279_s0 + $0x18] sm:$0xff]  ;;  %v94_v13 = vld [vmem:[%s2279_s0 + $0x48] sm:$0xff] }
   0x5   :  { %1316 = vmatpush.msra.mxu2 %v103_v1  ;;  %1317 = vmatpush.msra.mxu3 %v103_v1  ;;  %v93_v6 = vld [vmem:[%s2279_s0 + $0x40] sm:$0xff]  ;;  %v92_v12 = vld [vmem:[%s2279_s0 + $0x38] sm:$0xff]  ;;  %v95_v14 = vld [vmem:[%s2279_s0 + $0x50] sm:$0xff] }
   0x6   :  { %172 = vmatpush.msra.mxu0 %v102_v2  ;;  %1318 = vmatpush.msra.mxu1 %v102_v2  ;;  %v96_v15 = vld [vmem:[%s2279_s0 + $0x58] sm:$0xff]  ;;  %v1498_v16 = vld [vmem:[%s2280_s2] ss:$0 sm:$0xff]  ;;  %v98_v30 = vld [vmem:[%s2279_s0 + $0x68] sm:$0xff] }
   0x7   :  { %1319 = vmatpush.msra.mxu2 %v102_v2  ;;  %1320 = vmatpush.msra.mxu3 %v102_v2  ;;  %v97_v19 = vld [vmem:[%s2279_s0 + $0x60] sm:$0xff] }
   0x8   :  { %173 = vmatpush.msra.mxu0 %v101_v3  ;;  %1321 = vmatpush.msra.mxu1 %v101_v3 }
   0x9   :  { %1232 = vmatmul.msk.f32.vlgmr.msra.gmra.mxu0 %vm109_vm0, %v85_v4  ;;  %1236 = vmatmul.msk.f32.vlgmr.msra.gmra.mxu1 %vm109_vm0, %v89_v5 }
   0xa   :  { %1322 = vmatpush.msra.mxu2 %v101_v3  ;;  %1323 = vmatpush.msra.mxu3 %v101_v3  ;;  %v99_v3 = vld [vmem:[%s2279_s0 + $0x70] sm:$0xff] }
   0xb   :  { %1240 = vmatmul.msk.f32.vlgmr.msra.gmra.mxu2 %vm109_vm0, %v93_v6  ;;  %1244 = vmatmul.msk.f32.vlgmr.msra.gmra.mxu3 %vm109_vm0, %v97_v19 }
  0x11   :  { %1233 = vmatmul.msk.f32.gmra.mxu0 %vm109_vm0, %v86_v7  ;;  %1237 = vmatmul.msk.f32.gmra.mxu1 %vm109_vm0, %v90_v8 }
  0x13   :  { %1241 = vmatmul.msk.f32.gmra.mxu2 %vm109_vm0, %v94_v13  ;;  %1245 = vmatmul.msk.f32.gmra.mxu3 %vm109_vm0, %v98_v30 }
  0x19   :  { %1234 = vmatmul.msk.f32.gmra.mxu0 %vm109_vm0, %v87_v9  ;;  %1238 = vmatmul.msk.f32.gmra.mxu1 %vm109_vm0, %v91_v10 }
  0x1b   :  { %1242 = vmatmul.msk.f32.gmra.mxu2 %vm109_vm0, %v95_v14  ;;  %1246 = vmatmul.msk.f32.gmra.mxu3 %vm109_vm0, %v99_v3 }
  0x21   :  { %1235 = vmatmul.msk.f32.gmra.mxu0 %vm109_vm0, %v88_v11  ;;  %1239 = vmatmul.msk.f32.gmra.mxu1 %vm109_vm0, %v92_v12 }
  0x23   :  { %1243 = vmatmul.msk.f32.gmra.mxu2 %vm109_vm0, %v96_v15 }
  0x86   :  { %v175_v17 = vpop.f32.mrf.mxu0  ;;  %v187_v18 = vpop.f32.mrf.mxu1 }
  0x87   :  { %v176_v20 = vadd.f32 %v1498_v16, %v175_v17  ;;  %v188_v21 = vadd.f32 %v1498_v16, %v187_v18 }
  0x89   :  { %v255_v22 = vmul.f32 0.044715, %v176_v20  ;;  %v259_v23 = vmul.f32 0.044715, %v188_v21  ;;  %v243_v24 = vmul.f32 0.7978846, %v188_v21 }
  0x8a   :  { %v239_v28 = vmul.f32 0.7978846, %v176_v20  ;;  %v227_v45 = vmul.f32 0.5, %v188_v21  ;;  %v223_v56 = vmul.f32 0.5, %v176_v20 }
  0x8b   :  { %v275_v25 = vmul.f32 %v259_v23, %v188_v21  ;;  %v271_v26 = vmul.f32 %v255_v22, %v176_v20  ;;  %v100_v23 = vld [vmem:[%s2279_s0 + $0x78] sm:$0xff] }
  0x8c   :  { %1247 = vmatmul.msk.f32.gmra.mxu3 %vm109_vm0, %v100_v23 }
  0x8d   :  { %v291_v27 = vadd.f32 1.0, %v275_v25  ;;  %v287_v29 = vadd.f32 1.0, %v271_v26 }
  0x8e   :  { %v178_v31 = vpop.f32.mrf.mxu0  ;;  %v190_v32 = vpop.f32.mrf.mxu1 }
  0x8f   :  { %v179_v33 = vadd.f32 %v1498_v16, %v178_v31  ;;  %v191_v34 = vadd.f32 %v1498_v16, %v190_v32  ;;  %v307_v35 = vmul.f32 %v291_v27, %v243_v24  ;;  %v303_v36 = vmul.f32 %v287_v29, %v239_v28 }
  0x91   :  { %v256_v37 = vmul.f32 0.044715, %v179_v33  ;;  %1328 = vtanh.f32 %v307_v35  ;;  %v260_v38 = vmul.f32 0.044715, %v191_v34  ;;  %v244_v40 = vmul.f32 0.7978846, %v191_v34 }
  0x92   :  { %1330 = vtanh.f32 %v303_v36  ;;  %v240_v42 = vmul.f32 0.7978846, %v179_v33  ;;  %v228_v7 = vmul.f32 0.5, %v191_v34  ;;  %v224_v10 = vmul.f32 0.5, %v179_v33 }
  0x93   :  { %v272_v39 = vmul.f32 %v256_v37, %v179_v33  ;;  %v276_v41 = vmul.f32 %v260_v38, %v191_v34 }
  0x95   :  { %v288_v43 = vadd.f32 1.0, %v272_v39  ;;  %v292_v46 = vadd.f32 1.0, %v276_v41 }
  0x96   :  { %v181_v44 = vpop.f32.mrf.mxu0  ;;  %v193_v47 = vpop.f32.mrf.mxu1 }
  0x97   :  { %v1329_v48 = vpop.eup %1328  ;;  %v182_v49 = vadd.f32 %v1498_v16, %v181_v44  ;;  %v304_v50 = vmul.f32 %v288_v43, %v240_v42  ;;  %v194_v51 = vadd.f32 %v1498_v16, %v193_v47  ;;  %v308_v54 = vmul.f32 %v292_v46, %v244_v40  ;;  %v199_v42 = vpop.f32.mrf.mxu2 }
  0x98   :  { %v1331_v52 = vpop.eup %1330  ;;  %v339_v53 = vadd.f32 1.0, %v1329_v48  ;;  %v1394_v43 = vmov 32.0  }
  0x99   :  { %v257_v55 = vmul.f32 0.044715, %v182_v49  ;;  %v335_v57 = vadd.f32 1.0, %v1331_v52  ;;  %1332 = vtanh.f32 %v304_v50  ;;  %v261_v59 = vmul.f32 0.044715, %v194_v51 }
  0x9a   :  { %v1514_v58 = vmul.f32 %v339_v53, %v227_v45  ;;  %1334 = vtanh.f32 %v308_v54  ;;  %v241_v61 = vmul.f32 0.7978846, %v182_v49  ;;  %v245_v12 = vmul.f32 0.7978846, %v194_v51 }
  0x9b   :  { %v1516_v60 = vmul.f32 %v335_v57, %v223_v56  ;;  %v273_v62 = vmul.f32 %v257_v55, %v182_v49  ;;  %v277_v0 = vmul.f32 %v261_v59, %v194_v51  ;;  %v225_v26 = vmul.f32 0.5, %v182_v49 }
  0x9c   :  { %v379_v63 = vsel %vm109_vm0, %v1514_v58, 0.0  ;;  %v229_v37 = vmul.f32 0.5, %v194_v51  ;;  %v200_v51 = vadd.f32 %v1498_v16, %v199_v42 }
  0x9d   :  { %380 = vadd.xlane.f32.xlu2 %v379_v63  ;;  %v367_v1 = vsel %vm109_vm0, %v1516_v60, 0.0  ;;  %v289_v2 = vadd.f32 1.0, %v273_v62  ;;  %v293_v13 = vadd.f32 1.0, %v277_v0 }
  0x9e   :  { %368 = vadd.xlane.f32.xlu0 %v367_v1  ;;  %v184_v4 = vpop.f32.mrf.mxu0  ;;  %v196_v44 = vpop.f32.mrf.mxu1  ;;  %v263_v55 = vmul.f32 0.044715, %v200_v51  ;;  %v247_v1 = vmul.f32 0.7978846, %v200_v51 }
  0x9f   :  { %v1333_v5 = vpop.eup %1332  ;;  %v185_v6 = vadd.f32 %v1498_v16, %v184_v4  ;;  %v305_v8 = vmul.f32 %v289_v2, %v241_v61  ;;  %v309_v22 = vmul.f32 %v293_v13, %v245_v12  ;;  %v197_v45 = vadd.f32 %v1498_v16, %v196_v44  ;;  %v202_v46 = vpop.f32.mrf.mxu2 }
  0xa0   :  { %v1335_v9 = vpop.eup %1334  ;;  %v336_v11 = vadd.f32 1.0, %v1333_v5  ;;  %v1554_v59 = vadd.f32 %v1498_v16, %v202_v46  ;;  %v279_v61 = vmul.f32 %v263_v55, %v200_v51 }
  0xa1   :  { %v258_v14 = vmul.f32 0.044715, %v185_v6  ;;  %v340_v15 = vadd.f32 1.0, %v1335_v9  ;;  %1336 = vtanh.f32 %v305_v8  ;;  %v242_v18 = vmul.f32 0.7978846, %v185_v6 }
  0xa2   :  { %v1527_v17 = vmul.f32 %v336_v11, %v224_v10  ;;  %1338 = vtanh.f32 %v309_v22  ;;  %v226_v33 = vmul.f32 0.5, %v185_v6  ;;  %v262_v48 = vmul.f32 0.044715, %v197_v45  ;;  %v211_v11 = vpop.f32.mrf.mxu3 }
  0xa3   :  { %v274_v19 = vmul.f32 %v258_v14, %v185_v6  ;;  %v1529_v20 = vmul.f32 %v340_v15, %v228_v7  ;;  %v246_v54 = vmul.f32 0.7978846, %v197_v45  ;;  %v264_v0 = vmul.f32 0.044715, %v1554_v59 }
  0xa4   :  { %v370_v21 = vsel %vm109_vm0, %v1527_v17, 0.0  ;;  %v278_v50 = vmul.f32 %v262_v48, %v197_v45  ;;  %v295_v3 = vadd.f32 1.0, %v279_v61  ;;  %v248_v14 = vmul.f32 0.7978846, %v1554_v59 }
  0xa5   :  { %v382_v24 = vsel %vm109_vm0, %v1529_v20, 0.0  ;;  %v290_v25 = vadd.f32 1.0, %v274_v19  ;;  %v280_v5 = vmul.f32 %v264_v0, %v1554_v59  ;;  %v230_v22 = vmul.f32 0.5, %v197_v45 }
  0xa6   :  { %383 = vadd.xlane.f32.xlu2 %v382_v24  ;;  %371 = vadd.xlane.f32.xlu0 %v370_v21  ;;  %v294_v56 = vadd.f32 1.0, %v278_v50  ;;  %v311_v10 = vmul.f32 %v295_v3, %v247_v1  ;;  %v231_v45 = vmul.f32 0.5, %v200_v51  ;;  %v232_v0 = vmul.f32 0.5, %v1554_v59 }
  0xa7   :  { %v1337_v27 = vpop.eup %1336  ;;  %v306_v28 = vmul.f32 %v290_v25, %v242_v18  ;;  %v205_v53 = vpop.f32.mrf.mxu2  ;;  %v296_v18 = vadd.f32 1.0, %v280_v5 }
  0xa8   :  { %v337_v29 = vadd.f32 1.0, %v1337_v27  ;;  %v1339_v32 = vpop.eup %1338  ;;  %v310_v62 = vmul.f32 %v294_v56, %v246_v54  ;;  %v1561_v6 = vadd.f32 %v1498_v16, %v205_v53 }
  0xa9   :  { %1340 = vtanh.f32 %v306_v28  ;;  %v341_v38 = vadd.f32 1.0, %v1339_v32 }
  0xaa   :  { %v1539_v30 = vmul.f32 %v337_v29, %v225_v26  ;;  %1342 = vrcp.f32 %v1394_v43  ;;  %v265_v15 = vmul.f32 0.044715, %v1561_v6  ;;  %v312_v26 = vmul.f32 %v296_v18, %v248_v14 }
  0xab   :  { %v1547_v40 = vmul.f32 %v341_v38, %v229_v37  ;;  %1344 = vtanh.f32 %v310_v62 }
  0xac   :  { %v373_v31 = vsel %vm109_vm0, %v1539_v30, 0.0  ;;  %1346 = vtanh.f32 %v311_v10  ;;  %v281_v25 = vmul.f32 %v265_v15, %v1561_v6 }
  0xad   :  { %374 = vadd.xlane.f32.xlu1 %v373_v31  ;;  %v385_v41 = vsel %vm109_vm0, %v1547_v40, 0.0  ;;  %v249_v31 = vmul.f32 0.7978846, %v1561_v6  ;;  %1348 = vtanh.f32 %v312_v26 }
  0xae   :  { %v297_v37 = vadd.f32 1.0, %v281_v25 }
  0xaf   :  { %v1341_v34 = vpop.eup %1340  ;;  %v208_v2 = vpop.f32.mrf.mxu2 }
  0xb0   :  { %v338_v35 = vadd.f32 1.0, %v1341_v34  ;;  %v1343_v47 = vpop.eup %1342  ;;  %v1564_v8 = vadd.f32 %v1498_v16, %v208_v2  ;;  %v313_v50 = vmul.f32 %v297_v37, %v249_v31 }
  0xb1   :  { %v416_v49 = vmul.f32 32.0, %v1343_v47  ;;  %vm420_vm1 = vweird.f32 %v1343_v47  ;;  %v1345_v12 = vpop.eup %1344 }
  0xb2   :  { %v1543_v36 = vmul.f32 %v338_v35, %v226_v33  ;;  %v266_v19 = vmul.f32 0.044715, %v1564_v8  ;;  %v342_v23 = vadd.f32 1.0, %v1345_v12  ;;  %v1347_v33 = vpop.eup %1346  ;;  %v250_v38 = vmul.f32 0.7978846, %v1564_v8 }
  0xb3   :  { %v417_v52 = vsub.f32 1.0, %v416_v49  ;;  %v343_v46 = vadd.f32 1.0, %v1347_v33  ;;  %v1349_v54 = vpop.eup %1348  ;;  %1350 = vtanh.f32 %v313_v50  ;;  %v234_v26 = vmul.f32 0.5, %v1564_v8 }
  0xb4   :  { %v376_v39 = vsel %vm109_vm0, %v1543_v36, 0.0  ;;  %v282_v28 = vmul.f32 %v266_v19, %v1564_v8  ;;  %v1583_v32 = vmul.f32 %v342_v23, %v230_v22  ;;  %v344_v1 = vadd.f32 1.0, %v1349_v54 }
  0xb5   :  { %377 = vadd.xlane.f32.xlu1 %v376_v39  ;;  %v418_v57 = vmul.f32 %v1343_v47, %v417_v52  ;;  %v214_v39 = vpop.f32.mrf.mxu3  ;;  %v1603_v51 = vmul.f32 %v343_v46, %v231_v45 }
  0xb6   :  { %v388_v44 = vsel %vm109_vm0, %v1583_v32, 0.0  ;;  %v1597_v49 = vadd.f32 %v1498_v16, %v214_v39  ;;  %v1619_v59 = vmul.f32 %v344_v1, %v232_v0  ;;  %v810_v0 = vld [vmem:[%s2283_s5 + $0x60] sm:$0xff]  ;;  %v811_v1 = vld [vmem:[%s2283_s5 + $0x68] sm:$0xff] }
  0xb7   :  { %v419_v63 = vadd.f32 %v1343_v47, %v418_v57  ;;  %885 = vmatpush.msrb.mxu1 %v810_v0  ;;  %950 = vmatpush.msrb.mxu2 %v811_v1 }
  0xb8   :  { %v268_v61 = vmul.f32 0.044715, %v1597_v49  ;;  %v252_v19 = vmul.f32 0.7978846, %v1597_v49  ;;  %v394_v22 = vsel %vm109_vm0, %v1619_v59, 0.0 }
  0xb9   :  { %v1557_v4 = vsel %vm420_vm1, %v1343_v47, %v419_v63  ;;  %v1351_v12 = vpop.eup %1350 }
  0xba   :  { %v345_v25 = vadd.f32 1.0, %v1351_v12  ;;  %v809_v12 = vld [vmem:[%s2283_s5 + $0x58] sm:$0xff] }
  0xbd   :  { %386 = vadd.xlane.f32.xlu1 %v385_v41  ;;  %v298_v41 = vadd.f32 1.0, %v282_v28 }
  0xbf   :  { %v314_v53 = vmul.f32 %v298_v41, %v250_v38 }
  0xc1   :  { %1352 = vtanh.f32 %v314_v53  ;;  %v217_v53 = vpop.f32.mrf.mxu3 }
  0xc2   :  { %v1668_v54 = vadd.f32 %v1498_v16, %v217_v53 }
  0xc7   :  { %v1353_v14 = vpop.eup %1352 }
 0x110   :  { %v381_v42 = vpop.xlane.xlu2 %380 }
 0x111   :  { %v369_v7 = vpop.xlane.xlu0 %368  ;;  %v426_v57 = vmul.f32 %v1557_v4, %v381_v42 }
 0x112   :  { %v422_v9 = vmul.f32 %v1557_v4, %v369_v7  ;;  %v391_v7 = vsel %vm109_vm0, %v1603_v51, 0.0 }
 0x113   :  { %v1613_v2 = vsub.f32 %v1514_v58, %v426_v57  ;;  %v220_v57 = vpop.f32.mrf.mxu3 }
 0x114   :  { %v1568_v13 = vsub.f32 %v1516_v60, %v422_v9  ;;  %v1578_v60 = vadd.f32 %v1498_v16, %v211_v11  ;;  %v284_v9 = vmul.f32 %v268_v61, %v1597_v49  ;;  %v1673_v61 = vadd.f32 %v1498_v16, %v220_v57  ;;  %v813_v16 = vld [vmem:[%s2283_s5 + $0x78] sm:$0xff] }
 0x115   :  { %v458_v18 = vmul.f32 %v1613_v2, %v1613_v2  ;;  %1080 = vmatpush.msrb.mxu0 %v813_v16 }
 0x116   :  { %v454_v21 = vmul.f32 %v1568_v13, %v1568_v13  ;;  %v267_v35 = vmul.f32 0.044715, %v1578_v60  ;;  %v251_v56 = vmul.f32 0.7978846, %v1578_v60  ;;  %v235_v39 = vmul.f32 0.5, %v1578_v60 }
 0x117   :  { %v482_v31 = vsel %vm109_vm0, %v458_v18, 0.0  ;;  %1081 = vmatpush.msrb.mxu0 %v809_v12 }
 0x118   :  { %v470_v24 = vsel %vm109_vm0, %v454_v21, 0.0  ;;  %v283_v48 = vmul.f32 %v267_v35, %v1578_v60  ;;  %v300_v21 = vadd.f32 1.0, %v284_v9  ;;  %v808_v9 = vld [vmem:[%s2283_s5 + $0x50] sm:$0xff] }
 0x119   :  { %471 = vadd.xlane.f32.xlu0 %v470_v24  ;;  %v372_v27 = vpop.xlane.xlu0 %371  ;;  %v384_v3 = vpop.xlane.xlu2 %383  ;;  %v233_v24 = vmul.f32 0.5, %v1561_v6 }
 0x11a   :  { %v423_v29 = vmul.f32 %v1557_v4, %v372_v27  ;;  %v299_v62 = vadd.f32 1.0, %v283_v48  ;;  %v427_v15 = vmul.f32 %v1557_v4, %v384_v3  ;;  %v316_v33 = vmul.f32 %v300_v21, %v252_v19  ;;  %v802_v19 = vld [vmem:[%s2283_s5 + $0x20] sm:$0xff]  ;;  %v803_v21 = vld [vmem:[%s2283_s5 + $0x28] sm:$0xff] }
 0x11b   :  { %v1639_v35 = vmul.f32 %v345_v25, %v233_v24  ;;  %v270_v3 = vmul.f32 0.044715, %v1673_v61  ;;  %v798_v24 = vld [vmem:[%s2283_s5] sm:$0xff]  ;;  %v799_v25 = vld [vmem:[%s2283_s5 + $0x8] sm:$0xff] }
 0x11c   :  { %v1586_v34 = vsub.f32 %v1527_v17, %v423_v29  ;;  %v315_v10 = vmul.f32 %v299_v62, %v251_v56  ;;  %v1635_v27 = vsub.f32 %v1529_v20, %v427_v15  ;;  %v269_v56 = vmul.f32 0.044715, %v1668_v54 }
 0x11d   :  { %v397_v38 = vsel %vm109_vm0, %v1639_v35, 0.0  ;;  %v253_v62 = vmul.f32 0.7978846, %v1668_v54  ;;  %v286_v15 = vmul.f32 %v270_v3, %v1673_v61  ;;  %v1750_v3 = vld [vmem:[%s2281_s3] ss:$0 sm:$0xff] }
 0x11e   :  { %v455_v43 = vmul.f32 %v1586_v34, %v1586_v34  ;;  %1354 = vtanh.f32 %v315_v10  ;;  %v459_v20 = vmul.f32 %v1635_v27, %v1635_v27 }
 0x11f   :  { %1356 = vtanh.f32 %v316_v33 }
 0x120   :  { %v375_v47 = vpop.xlane.xlu1 %374  ;;  %v473_v17 = vsel %vm109_vm0, %v455_v43, 0.0 }
 0x121   :  { %v424_v52 = vmul.f32 %v1557_v4, %v375_v47  ;;  %389 = vadd.xlane.f32.xlu0 %v388_v44  ;;  %474 = vadd.xlane.f32.xlu2 %v473_v17  ;;  %v485_v44 = vsel %vm109_vm0, %v459_v20, 0.0  ;;  %v236_v17 = vmul.f32 0.5, %v1597_v49  ;;  %v285_v49 = vmul.f32 %v269_v56, %v1668_v54 }
 0x123   :  { %v1601_v55 = vsub.f32 %v1539_v30, %v424_v52 }
 0x124   :  { %v1355_v37 = vpop.eup %1354 }
 0x125   :  { %v456_v63 = vmul.f32 %v1601_v55, %v1601_v55  ;;  %v347_v41 = vadd.f32 1.0, %v1355_v37  ;;  %v1357_v46 = vpop.eup %1356 }
 0x126   :  { %v348_v48 = vadd.f32 1.0, %v1357_v46 }
 0x127   :  { %v476_v30 = vsel %vm109_vm0, %v456_v63, 0.0  ;;  %v1655_v45 = vmul.f32 %v347_v41, %v235_v39  ;;  %v301_v63 = vadd.f32 1.0, %v285_v49 }
 0x128   :  { %477 = vadd.xlane.f32.xlu1 %v476_v30  ;;  %v378_v5 = vpop.xlane.xlu1 %377  ;;  %v1663_v50 = vmul.f32 %v348_v48, %v236_v17  ;;  %v812_v30 = vld [vmem:[%s2283_s5 + $0x70] sm:$0xff] }
 0x129   :  { %v425_v11 = vmul.f32 %v1557_v4, %v378_v5  ;;  %392 = vadd.xlane.f32.xlu2 %v391_v7  ;;  %v403_v60 = vsel %vm109_vm0, %v1655_v45, 0.0  ;;  %1015 = vmatpush.msrb.mxu3 %v812_v30  ;;  %v806_v5 = vld [vmem:[%s2283_s5 + $0x40] sm:$0xff]  ;;  %v807_v7 = vld [vmem:[%s2283_s5 + $0x48] sm:$0xff] }
 0x12a   :  { %v406_v52 = vsel %vm109_vm0, %v1663_v50, 0.0  ;;  %886 = vmatpush.msrb.mxu1 %v806_v5  ;;  %951 = vmatpush.msrb.mxu2 %v807_v7 }
 0x12b   :  { %v1623_v58 = vsub.f32 %v1543_v36, %v425_v11  ;;  %v346_v36 = vadd.f32 1.0, %v1353_v14  ;;  %v317_v11 = vmul.f32 %v301_v63, %v253_v62  ;;  %1016 = vmatpush.msrb.mxu3 %v808_v9  ;;  %v1759_v9 = vld [vmem:[%s2282_s4] ss:$0 sm:$0xff] }
 0x12c   :  { %887 = vmatpush.msrb.mxu1 %v802_v19  ;;  %952 = vmatpush.msrb.mxu2 %v803_v21 }
 0x12d   :  { %v457_v23 = vmul.f32 %v1623_v58, %v1623_v58  ;;  %v1641_v6 = vmul.f32 %v346_v36, %v234_v26  ;;  %1358 = vtanh.f32 %v317_v11  ;;  %v800_v26 = vld [vmem:[%s2283_s5 + $0x10] sm:$0xff]  ;;  %v254_v36 = vmul.f32 0.7978846, %v1673_v61 }
 0x12e   :  { %888 = vmatpush.msrb.mxu1 %v798_v24  ;;  %953 = vmatpush.msrb.mxu2 %v799_v25 }
 0x12f   :  { %v479_v28 = vsel %vm109_vm0, %v457_v23, 0.0  ;;  %v400_v42 = vsel %vm109_vm0, %v1641_v6, 0.0  ;;  %v805_v23 = vld [vmem:[%s2283_s5 + $0x38] sm:$0xff] }
 0x130   :  { %395 = vadd.xlane.f32.xlu1 %v394_v22  ;;  %v387_v29 = vpop.xlane.xlu1 %386  ;;  %480 = vadd.xlane.f32.xlu0 %v479_v28  ;;  %v804_v22 = vld [vmem:[%s2283_s5 + $0x30] sm:$0xff]  ;;  %v302_v28 = vadd.f32 1.0, %v286_v15  ;;  %v238_v15 = vmul.f32 0.5, %v1673_v61 }
 0x131   :  { %483 = vadd.xlane.f32.xlu2 %v482_v31  ;;  %v428_v8 = vmul.f32 %v1557_v4, %v387_v29  ;;  %1017 = vmatpush.msrb.mxu3 %v804_v22  ;;  %v801_v29 = vld [vmem:[%s2283_s5 + $0x18] sm:$0xff] }
 0x132   :  { %1082 = vmatpush.msrb.mxu0 %v805_v23 }
 0x133   :  { %v1652_v43 = vsub.f32 %v1547_v40, %v428_v8  ;;  %1018 = vmatpush.msrb.mxu3 %v800_v26  ;;  %v1359_v20 = vpop.eup %1358 }
 0x134   :  { %1083 = vmatpush.msrb.mxu0 %v801_v29  ;;  %v349_v17 = vadd.f32 1.0, %v1359_v20 }
 0x135   :  { %v460_v47 = vmul.f32 %v1652_v43, %v1652_v43 }
 0x137   :  { %v488_v40 = vsel %vm109_vm0, %v460_v47, 0.0 }
 0x138   :  { %486 = vadd.xlane.f32.xlu1 %v485_v44  ;;  %398 = vadd.xlane.f32.xlu0 %v397_v38  ;;  %v318_v38 = vmul.f32 %v302_v28, %v254_v36 }
 0x139   :  { %401 = vadd.xlane.f32.xlu2 %v400_v42 }
 0x140   :  { %404 = vadd.xlane.f32.xlu1 %v403_v60  ;;  %489 = vadd.xlane.f32.xlu0 %v488_v40  ;;  %v237_v60 = vmul.f32 0.5, %v1668_v54 }
 0x142   :  { %v1741_v62 = vmul.f32 %v349_v17, %v237_v60 }
 0x148   :  { %407 = vadd.xlane.f32.xlu0 %v406_v52 }
 0x18c   :  { %v472_v10 = vpop.xlane.xlu0 %471 }
 0x18d   :  { %v518_v14 = vmul.f32 %v472_v10, %v1557_v4 }
 0x18f   :  { %v534_v18 = vadd.f32 1e-05, %v518_v14 }
 0x191   :  { %1360 = vrsqrt.f32 %v534_v18  ;;  %vm556_vm3 = vweird.f32 %v534_v18 }
 0x194   :  { %v475_v31 = vpop.xlane.xlu2 %474  ;;  %v390_v33 = vpop.xlane.xlu0 %389 }
 0x195   :  { %v519_v37 = vmul.f32 %v475_v31, %v1557_v4  ;;  %v429_v8 = vmul.f32 %v1557_v4, %v390_v33 }
 0x197   :  { %v1361_v39 = vpop.eup %1360  ;;  %v535_v41 = vadd.f32 1e-05, %v519_v37  ;;  %v1731_v42 = vsub.f32 %v1583_v32, %v429_v8 }
 0x198   :  { %v551_v44 = vmul.f32 %v1361_v39, %v534_v18  ;;  %vm557_vm2 = vweird.f32 %v1361_v39 }
 0x199   :  { %1362 = vrsqrt.f32 %v535_v41  ;;  %v461_v46 = vmul.f32 %v1731_v42, %v1731_v42  ;;  %vm558_vm4 = vmor %vm556_vm3, %vm557_vm2  ;;  %vm566_vm6 = vweird.f32 %v535_v41 }
 0x19a   :  { %v552_v47 = vmul.f32 %v1361_v39, %v551_v44  ;;  %1364 = vtanh.f32 %v318_v38 }
 0x19b   :  { %v478_v48 = vpop.xlane.xlu1 %477  ;;  %v491_v40 = vsel %vm109_vm0, %v461_v46, 0.0 }
 0x19c   :  { %v553_v52 = vmul.f32 0.5, %v552_v47  ;;  %v520_v53 = vmul.f32 %v478_v48, %v1557_v4  ;;  %v393_v56 = vpop.xlane.xlu2 %392  ;;  %492 = vadd.xlane.f32.xlu2 %v491_v40 }
 0x19d   :  { %v430_v32 = vmul.f32 %v1557_v4, %v393_v56 }
 0x19e   :  { %v554_v57 = vsub.f32 1.5, %v553_v52  ;;  %v1739_v49 = vadd.f32 1e-05, %v520_v53 }
 0x19f   :  { %v1363_v63 = vpop.eup %1362  ;;  %v1744_v54 = vsub.f32 %v1603_v51, %v430_v32  ;;  %v409_v51 = vsel %vm109_vm0, %v1741_v62, 0.0 }
 0x1a0   :  { %v1365_v0 = vpop.eup %1364  ;;  %v555_v1 = vmul.f32 %v1361_v39, %v554_v57  ;;  %v561_v30 = vmul.f32 %v1363_v63, %v535_v41  ;;  %1366 = vrsqrt.f32 %v1739_v49  ;;  %vm567_vm5 = vweird.f32 %v1363_v63 }
 0x1a1   :  { %v462_v16 = vmul.f32 %v1744_v54, %v1744_v54  ;;  %v350_v18 = vadd.f32 1.0, %v1365_v0  ;;  %vm568_vm7 = vmor %vm566_vm6, %vm567_vm5  ;;  %vm576_vm9 = vweird.f32 %v1739_v49 }
 0x1a2   :  { %v559_v5 = vsel %vm558_vm4, %v1361_v39, %v555_v1  ;;  %v562_v7 = vmul.f32 %v1363_v63, %v561_v30 }
 0x1a3   :  { %v710_v10 = vmul.f32 %v559_v5, %v1568_v13  ;;  %v396_v11 = vpop.xlane.xlu1 %395  ;;  %v494_v12 = vsel %vm109_vm0, %v462_v16, 0.0  ;;  %v481_v14 = vpop.xlane.xlu0 %480  ;;  %v1777_v33 = vmul.f32 %v350_v18, %v238_v15 }
 0x1a4   :  { %v563_v19 = vmul.f32 0.5, %v562_v7  ;;  %v431_v21 = vmul.f32 %v1557_v4, %v396_v11  ;;  %495 = vadd.xlane.f32.xlu1 %v494_v12  ;;  %v484_v22 = vpop.xlane.xlu2 %483  ;;  %410 = vadd.xlane.f32.xlu2 %v409_v51  ;;  %v521_v23 = vmul.f32 %v481_v14, %v1557_v4 }
 0x1a5   :  { %v730_v24 = vmul.f32 %v1750_v3, %v710_v10  ;;  %v522_v25 = vmul.f32 %v484_v22, %v1557_v4  ;;  %v412_v41 = vsel %vm109_vm0, %v1777_v33, 0.0 }
 0x1a6   :  { %v1367_v13 = vpop.eup %1366  ;;  %v564_v26 = vsub.f32 1.5, %v563_v19  ;;  %v1769_v36 = vsub.f32 %v1619_v59, %v431_v21  ;;  %v1771_v61 = vadd.f32 1e-05, %v521_v23 }
 0x1a7   :  { %v750_v28 = vadd.f32 %v1759_v9, %v730_v24  ;;  %v571_v29 = vmul.f32 %v1367_v13, %v1739_v49  ;;  %v1775_v31 = vadd.f32 1e-05, %v522_v25  ;;  %vm577_vm8 = vweird.f32 %v1367_v13 }
 0x1a8   :  { %v565_v37 = vmul.f32 %v1363_v63, %v564_v26  ;;  %1368 = vrsqrt.f32 %v1771_v61  ;;  %v463_v8 = vmul.f32 %v1769_v36, %v1769_v36  ;;  %vm578_vm10 = vmor %vm576_vm9, %vm577_vm8  ;;  %vm586_vm13 = vweird.f32 %v1771_v61 }
 0x1a9   :  { %766 = vst.msk [vmem:[#allocation2] sm:$0xff] %vm109_vm0, %v750_v28  ;;  %v572_v59 = vmul.f32 %v1367_v13, %v571_v29  ;;  %1370 = vrsqrt.f32 %v1775_v31  ;;  %vm596_vm14 = vweird.f32 %v1775_v31 }
 0x1aa   :  { %v569_v20 = vsel %vm568_vm7, %v1363_v63, %v565_v37  ;;  %v497_v38 = vsel %vm109_vm0, %v463_v8, 0.0 }
 0x1ab   :  { %v711_v39 = vmul.f32 %v569_v20, %v1586_v34  ;;  %v573_v44 = vmul.f32 0.5, %v572_v59  ;;  %v487_v46 = vpop.xlane.xlu1 %486  ;;  %498 = vadd.xlane.f32.xlu0 %v497_v38  ;;  %v399_v47 = vpop.xlane.xlu0 %398 }
 0x1ac   :  { %v523_v60 = vmul.f32 %v487_v46, %v1557_v4  ;;  %413 = vadd.xlane.f32.xlu1 %v412_v41  ;;  %v402_v17 = vpop.xlane.xlu2 %401  ;;  %v432_v48 = vmul.f32 %v1557_v4, %v399_v47 }
 0x1ad   :  { %v731_v40 = vmul.f32 %v1750_v3, %v711_v39  ;;  %v574_v52 = vsub.f32 1.5, %v573_v44  ;;  %v433_v53 = vmul.f32 %v1557_v4, %v402_v17 }
 0x1ae   :  { %v1369_v34 = vpop.eup %1368  ;;  %v1792_v56 = vadd.f32 1e-05, %v523_v60  ;;  %v1795_v32 = vsub.f32 %v1639_v35, %v432_v48 }
 0x1af   :  { %v1371_v57 = vpop.eup %1370  ;;  %v751_v63 = vadd.f32 %v1759_v9, %v731_v40  ;;  %v575_v0 = vmul.f32 %v1367_v13, %v574_v52  ;;  %v581_v1 = vmul.f32 %v1369_v34, %v1771_v61  ;;  %v1804_v35 = vsub.f32 %v1641_v6, %v433_v53 }
 0x1b0   :  { %v591_v30 = vmul.f32 %v1371_v57, %v1775_v31  ;;  %1372 = vrsqrt.f32 %v1792_v56  ;;  %v782_v16 = vld [vmem:[#allocation2] sm:$0xff]  ;;  %v464_v10 = vmul.f32 %v1795_v32, %v1795_v32  ;;  %vm587_vm11 = vweird.f32 %v1369_v34 }
 0x1b1   :  { %767 = vst.msk [vmem:[#allocation2 + $0x8] sm:$0xff] %vm109_vm0, %v751_v63  ;;  %v579_v5 = vsel %vm578_vm10, %v1367_v13, %v575_v0  ;;  %v582_v7 = vmul.f32 %v1369_v34, %v581_v1  ;;  %1248 = vmatmul.msk.f32.vlgmr.msrb.gmra.mxu1 %vm109_vm0, %v782_v16  ;;  %1264 = vmatmul.msk.f32.vlgmr.msrb.gmra.mxu2 %vm109_vm0, %v782_v16  ;;  %vm597_vm12 = vweird.f32 %v1371_v57  ;;  %vm588_vm15 = vmor %vm586_vm13, %vm587_vm11  ;;  %vm606_vm3 = vweird.f32 %v1792_v56 }
 0x1b2   :  { %v712_v49 = vmul.f32 %v579_v5, %v1601_v55  ;;  %v592_v51 = vmul.f32 %v1371_v57, %v591_v30  ;;  %1280 = vmatmul.msk.f32.vlgmr.msrb.gmra.mxu3 %vm109_vm0, %v782_v16  ;;  %1296 = vmatmul.msk.f32.vlgmr.msrb.gmra.mxu0 %vm109_vm0, %v782_v16  ;;  %v465_v6 = vmul.f32 %v1804_v35, %v1804_v35  ;;  %v500_v55 = vsel %vm109_vm0, %v464_v10, 0.0  ;;  %vm598_vm1 = vmor %vm596_vm14, %vm597_vm12 }
 0x1b3   :  { %v583_v11 = vmul.f32 0.5, %v582_v7  ;;  %v405_v12 = vpop.xlane.xlu1 %404  ;;  %v490_v14 = vpop.xlane.xlu0 %489  ;;  %501 = vadd.xlane.f32.xlu2 %v500_v55 }
 0x1b4   :  { %v732_v15 = vmul.f32 %v1750_v3, %v712_v49  ;;  %v593_v18 = vmul.f32 0.5, %v592_v51  ;;  %v434_v19 = vmul.f32 %v1557_v4, %v405_v12  ;;  %v503_v22 = vsel %vm109_vm0, %v465_v6, 0.0 }
 0x1b5   :  { %v584_v21 = vsub.f32 1.5, %v583_v11  ;;  %v524_v23 = vmul.f32 %v490_v14, %v1557_v4  ;;  %504 = vadd.xlane.f32.xlu0 %v503_v22 }
 0x1b6   :  { %v1373_v24 = vpop.eup %1372  ;;  %v752_v25 = vadd.f32 %v1759_v9, %v732_v15  ;;  %v594_v13 = vsub.f32 1.5, %v593_v18  ;;  %v1822_v26 = vsub.f32 %v1655_v45, %v434_v19 }
 0x1b7   :  { %v585_v28 = vmul.f32 %v1369_v34, %v584_v21  ;;  %v601_v29 = vmul.f32 %v1373_v24, %v1792_v56  ;;  %v540_v37 = vadd.f32 1e-05, %v524_v23  ;;  %vm607_vm2 = vweird.f32 %v1373_v24 }
 0x1b8   :  { %768 = vst.msk [vmem:[#allocation2 + $0x10] sm:$0xff] %vm109_vm0, %v752_v25  ;;  %v595_v8 = vmul.f32 %v1371_v57, %v594_v13  ;;  %v783_v59 = vld [vmem:[#allocation2 + $0x8] sm:$0xff]  ;;  %v466_v20 = vmul.f32 %v1822_v26, %v1822_v26  ;;  %vm608_vm4 = vmor %vm606_vm3, %vm607_vm2 }
 0x1b9   :  { %v589_v45 = vsel %vm588_vm15, %v1369_v34, %v585_v28  ;;  %v602_v38 = vmul.f32 %v1373_v24, %v601_v29  ;;  %1374 = vrsqrt.f32 %v540_v37  ;;  %1249 = vmatmul.msk.f32.gmra.mxu1 %vm109_vm0, %v783_v59  ;;  %1265 = vmatmul.msk.f32.gmra.mxu2 %vm109_vm0, %v783_v59  ;;  %vm616_vm6 = vweird.f32 %v540_v37 }
 0x1ba   :  { %v599_v61 = vsel %vm598_vm1, %v1371_v57, %v595_v8  ;;  %v713_v39 = vmul.f32 %v589_v45, %v1623_v58  ;;  %1281 = vmatmul.msk.f32.gmra.mxu3 %vm109_vm0, %v783_v59  ;;  %1297 = vmatmul.msk.f32.gmra.mxu0 %vm109_vm0, %v783_v59  ;;  %v506_v31 = vsel %vm109_vm0, %v466_v20, 0.0 }
 0x1bb   :  { %v714_v44 = vmul.f32 %v599_v61, %v1613_v2  ;;  %v603_v46 = vmul.f32 0.5, %v602_v38  ;;  %507 = vadd.xlane.f32.xlu1 %v506_v31  ;;  %v408_v41 = vpop.xlane.xlu0 %407 }
 0x1bc   :  { %v733_v47 = vmul.f32 %v1750_v3, %v713_v39  ;;  %v435_v60 = vmul.f32 %v1557_v4, %v408_v41 }
 0x1bd   :  { %v734_v17 = vmul.f32 %v1750_v3, %v714_v44  ;;  %v604_v48 = vsub.f32 1.5, %v603_v46 }
 0x1be   :  { %v753_v58 = vadd.f32 %v1759_v9, %v733_v47  ;;  %v1843_v40 = vsub.f32 %v1663_v50, %v435_v60 }
 0x1bf   :  { %v1375_v52 = vpop.eup %1374  ;;  %v754_v53 = vadd.f32 %v1759_v9, %v734_v17  ;;  %v605_v2 = vmul.f32 %v1373_v24, %v604_v48  ;;  %v784_v34 = vld [vmem:[#allocation2 + $0x10] sm:$0xff] }
 0x1c0   :  { %769 = vst.msk [vmem:[#allocation2 + $0x18] sm:$0xff] %vm109_vm0, %v753_v58  ;;  %v611_v57 = vmul.f32 %v1375_v52, %v540_v37  ;;  %v467_v63 = vmul.f32 %v1843_v40, %v1843_v40  ;;  %vm617_vm5 = vweird.f32 %v1375_v52 }
 0x1c1   :  { %770 = vst.msk [vmem:[#allocation2 + $0x20] sm:$0xff] %vm109_vm0, %v754_v53  ;;  %v609_v0 = vsel %vm608_vm4, %v1373_v24, %v605_v2  ;;  %1250 = vmatmul.msk.f32.gmra.mxu1 %vm109_vm0, %v784_v34  ;;  %1266 = vmatmul.msk.f32.gmra.mxu2 %vm109_vm0, %v784_v34  ;;  %vm618_vm7 = vmor %vm616_vm6, %vm617_vm5  ;;  %v814_v2 = vld [vmem:[%s2284_s6] sm:$0xf] }
 0x1c2   :  { %v715_v50 = vmul.f32 %v609_v0, %v1635_v27  ;;  %v612_v1 = vmul.f32 %v1375_v52, %v611_v57  ;;  %1282 = vmatmul.msk.f32.gmra.mxu3 %vm109_vm0, %v784_v34  ;;  %1298 = vmatmul.msk.f32.gmra.mxu0 %vm109_vm0, %v784_v34  ;;  %v509_v56 = vsel %vm109_vm0, %v467_v63, 0.0 }
 0x1c3   :  { %510 = vadd.xlane.f32.xlu2 %v509_v56 }
 0x1c4   :  { %v735_v30 = vmul.f32 %v1750_v3, %v715_v50  ;;  %v613_v16 = vmul.f32 0.5, %v612_v1 }
 0x1c6   :  { %v755_v5 = vadd.f32 %v1759_v9, %v735_v30  ;;  %v614_v7 = vsub.f32 1.5, %v613_v16  ;;  %v1907_v16 = vperm.slane %v814_v2, 0 }
 0x1c7   :  { %v785_v49 = vld [vmem:[#allocation2 + $0x18] sm:$0xff] }
 0x1c8   :  { %771 = vst.msk [vmem:[#allocation2 + $0x28] sm:$0xff] %vm109_vm0, %v755_v5  ;;  %v615_v51 = vmul.f32 %v1375_v52, %v614_v7  ;;  %v786_v6 = vld [vmem:[#allocation2 + $0x20] sm:$0xff] }
 0x1c9   :  { %1251 = vmatmul.msk.f32.gmra.mxu1 %vm109_vm0, %v785_v49  ;;  %1267 = vmatmul.msk.f32.gmra.mxu2 %vm109_vm0, %v785_v49 }
 0x1ca   :  { %v619_v27 = vsel %vm618_vm7, %v1375_v52, %v615_v51  ;;  %1283 = vmatmul.msk.f32.gmra.mxu3 %vm109_vm0, %v785_v49  ;;  %1299 = vmatmul.msk.f32.gmra.mxu0 %vm109_vm0, %v785_v49  ;;  %v1912_v49 = vperm.slane %v814_v2, 3 }
 0x1cb   :  { %v716_v10 = vmul.f32 %v619_v27, %v1652_v43 }
 0x1cd   :  { %v736_v11 = vmul.f32 %v1750_v3, %v716_v10 }
 0x1cf   :  { %v756_v12 = vadd.f32 %v1759_v9, %v736_v11  ;;  %v787_v14 = vld [vmem:[#allocation2 + $0x28] sm:$0xff] }
 0x1d1   :  { %772 = vst.msk [vmem:[#allocation2 + $0x30] sm:$0xff] %vm109_vm0, %v756_v12  ;;  %1252 = vmatmul.msk.f32.gmra.mxu1 %vm109_vm0, %v786_v6  ;;  %1268 = vmatmul.msk.f32.gmra.mxu2 %vm109_vm0, %v786_v6 }
 0x1d2   :  { %1284 = vmatmul.msk.f32.gmra.mxu3 %vm109_vm0, %v786_v6  ;;  %1300 = vmatmul.msk.f32.gmra.mxu0 %vm109_vm0, %v786_v6 }
 0x1d8   :  { %v788_v43 = vld [vmem:[#allocation2 + $0x30] sm:$0xff] }
 0x1d9   :  { %1253 = vmatmul.msk.f32.gmra.mxu1 %vm109_vm0, %v787_v14  ;;  %1269 = vmatmul.msk.f32.gmra.mxu2 %vm109_vm0, %v787_v14 }
 0x1da   :  { %1285 = vmatmul.msk.f32.gmra.mxu3 %vm109_vm0, %v787_v14  ;;  %1301 = vmatmul.msk.f32.gmra.mxu0 %vm109_vm0, %v787_v14 }
 0x1e1   :  { %1254 = vmatmul.msk.f32.gmra.mxu1 %vm109_vm0, %v788_v43  ;;  %1270 = vmatmul.msk.f32.gmra.mxu2 %vm109_vm0, %v788_v43 }
 0x1e2   :  { %1286 = vmatmul.msk.f32.gmra.mxu3 %vm109_vm0, %v788_v43  ;;  %1302 = vmatmul.msk.f32.gmra.mxu0 %vm109_vm0, %v788_v43 }
 0x20f   :  { %v493_v15 = vpop.xlane.xlu2 %492 }
 0x210   :  { %v525_v18 = vmul.f32 %v493_v15, %v1557_v4 }
 0x212   :  { %v541_v19 = vadd.f32 1e-05, %v525_v18 }
 0x214   :  { %1376 = vrsqrt.f32 %v541_v19  ;;  %vm626_vm9 = vweird.f32 %v541_v19 }
 0x217   :  { %v496_v55 = vpop.xlane.xlu1 %495  ;;  %v411_v21 = vpop.xlane.xlu2 %410 }
 0x218   :  { %v526_v22 = vmul.f32 %v496_v55, %v1557_v4  ;;  %v436_v23 = vmul.f32 %v1557_v4, %v411_v21  ;;  %v1926_v55 = vperm.slane %v814_v2, 1 }
 0x21a   :  { %v1377_v24 = vpop.eup %1376  ;;  %v542_v25 = vadd.f32 1e-05, %v526_v22  ;;  %v1884_v13 = vsub.f32 %v1741_v62, %v436_v23  ;;  %v1932_v23 = vperm.slane %v814_v2, 2 }
 0x21b   :  { %v621_v28 = vmul.f32 %v1377_v24, %v541_v19  ;;  %vm627_vm8 = vweird.f32 %v1377_v24 }
 0x21c   :  { %1378 = vrsqrt.f32 %v542_v25  ;;  %v468_v29 = vmul.f32 %v1884_v13, %v1884_v13  ;;  %vm628_vm10 = vmor %vm626_vm9, %vm627_vm8  ;;  %vm636_vm12 = vweird.f32 %v542_v25 }
 0x21d   :  { %v622_v37 = vmul.f32 %v1377_v24, %v621_v28 }
 0x21e   :  { %v512_v8 = vsel %vm109_vm0, %v468_v29, 0.0  ;;  %v499_v59 = vpop.xlane.xlu0 %498 }
 0x21f   :  { %v623_v20 = vmul.f32 0.5, %v622_v37  ;;  %v414_v45 = vpop.xlane.xlu1 %413  ;;  %513 = vadd.xlane.f32.xlu0 %v512_v8  ;;  %v527_v38 = vmul.f32 %v499_v59, %v1557_v4 }
 0x220   :  { %v437_v61 = vmul.f32 %v1557_v4, %v414_v45 }
 0x221   :  { %v624_v39 = vsub.f32 1.5, %v623_v20  ;;  %v543_v62 = vadd.f32 1e-05, %v527_v38 }
 0x222   :  { %v1379_v31 = vpop.eup %1378  ;;  %v1892_v44 = vsub.f32 %v1777_v33, %v437_v61 }
 0x223   :  { %v625_v46 = vmul.f32 %v1377_v24, %v624_v39  ;;  %v631_v41 = vmul.f32 %v1379_v31, %v542_v25  ;;  %1380 = vrsqrt.f32 %v543_v62  ;;  %vm637_vm11 = vweird.f32 %v1379_v31 }
 0x224   :  { %v469_v47 = vmul.f32 %v1892_v44, %v1892_v44  ;;  %vm638_vm13 = vmor %vm636_vm12, %vm637_vm11  ;;  %vm646_vm15 = vweird.f32 %v543_v62 }
 0x225   :  { %v629_v60 = vsel %vm628_vm10, %v1377_v24, %v625_v46  ;;  %v632_v17 = vmul.f32 %v1379_v31, %v631_v41 }
 0x226   :  { %v717_v48 = vmul.f32 %v629_v60, %v1731_v42  ;;  %v515_v58 = vsel %vm109_vm0, %v469_v47, 0.0  ;;  %v502_v33 = vpop.xlane.xlu2 %501 }
 0x227   :  { %v633_v52 = vmul.f32 0.5, %v632_v17  ;;  %516 = vadd.xlane.f32.xlu1 %v515_v58  ;;  %v528_v63 = vmul.f32 %v502_v33, %v1557_v4 }
 0x228   :  { %v737_v53 = vmul.f32 %v1750_v3, %v717_v48  ;;  %v505_v0 = vpop.xlane.xlu0 %504 }
 0x229   :  { %v1381_v34 = vpop.eup %1380  ;;  %v634_v57 = vsub.f32 1.5, %v633_v52  ;;  %v529_v1 = vmul.f32 %v505_v0, %v1557_v4  ;;  %v1905_v30 = vadd.f32 1e-05, %v528_v63 }
 0x22a   :  { %v757_v50 = vadd.f32 %v1759_v9, %v737_v53  ;;  %v641_v42 = vmul.f32 %v1381_v34, %v543_v62  ;;  %vm647_vm14 = vweird.f32 %v1381_v34 }
 0x22b   :  { %v635_v56 = vmul.f32 %v1379_v31, %v634_v57  ;;  %v1910_v7 = vadd.f32 1e-05, %v529_v1  ;;  %1382 = vrsqrt.f32 %v1905_v30  ;;  %vm648_vm1 = vmor %vm646_vm15, %vm647_vm14  ;;  %vm656_vm4 = vweird.f32 %v1905_v30 }
 0x22c   :  { %773 = vst.msk [vmem:[#allocation2 + $0x38] sm:$0xff] %vm109_vm0, %v757_v50  ;;  %v642_v5 = vmul.f32 %v1381_v34, %v641_v42 }
 0x22d   :  { %v639_v51 = vsel %vm638_vm13, %v1379_v31, %v635_v56  ;;  %1384 = vrsqrt.f32 %v1910_v7  ;;  %vm666_vm6 = vweird.f32 %v1910_v7 }
 0x22e   :  { %v718_v27 = vmul.f32 %v639_v51, %v1744_v54  ;;  %v643_v10 = vmul.f32 0.5, %v642_v5  ;;  %v890_v11 = vpop.f32.mrf.mxu1  ;;  %v508_v12 = vpop.xlane.xlu1 %507 }
 0x22f   :  { %v891_v6 = vadd.f32 %v890_v11, %v1907_v16  ;;  %v1085_v14 = vpop.f32.mrf.mxu0  ;;  %v530_v43 = vmul.f32 %v508_v12, %v1557_v4 }
 0x230   :  { %v738_v15 = vmul.f32 %v1750_v3, %v718_v27  ;;  %v644_v18 = vsub.f32 1.5, %v643_v10  ;;  %v1086_v19 = vadd.f32 %v1085_v14, %v1912_v49 }
 0x231   :  { %1133 = vst [vmem:[%s2285_s7] sm:$0xff] %v891_v6  ;;  %v1924_v54 = vadd.f32 1e-05, %v530_v43  ;;  %v1934_v24 = vpop.eup %1382 }
 0x232   :  { %v758_v21 = vadd.f32 %v1759_v9, %v738_v15  ;;  %v645_v22 = vmul.f32 %v1381_v34, %v644_v18  ;;  %1136 = vst [vmem:[%s2285_s7 + $0x18] sm:$0xff] %v1086_v19  ;;  %v651_v37 = vmul.f32 %v1934_v24, %v1905_v30  ;;  %vm657_vm2 = vweird.f32 %v1934_v24 }
 0x233   :  { %1386 = vrsqrt.f32 %v1924_v54  ;;  %v789_v25 = vld [vmem:[#allocation2 + $0x38] sm:$0xff]  ;;  %v1937_v28 = vpop.eup %1384  ;;  %vm658_vm5 = vmor %vm656_vm4, %vm657_vm2  ;;  %vm676_vm9 = vweird.f32 %v1924_v54 }
 0x234   :  { %774 = vst.msk [vmem:[#allocation2 + $0x40] sm:$0xff] %vm109_vm0, %v758_v21  ;;  %v649_v29 = vsel %vm648_vm1, %v1381_v34, %v645_v22  ;;  %1255 = vmatmul.msk.f32.gmra.mxu1 %vm109_vm0, %v789_v25  ;;  %v955_v8 = vpop.f32.mrf.mxu2  ;;  %1271 = vmatmul.msk.f32.gmra.mxu2 %vm109_vm0, %v789_v25  ;;  %v661_v20 = vmul.f32 %v1937_v28, %v1910_v7  ;;  %vm667_vm3 = vweird.f32 %v1937_v28 }
 0x235   :  { %v719_v59 = vmul.f32 %v649_v29, %v1769_v36  ;;  %v956_v45 = vadd.f32 %v955_v8, %v1926_v55  ;;  %v1020_v38 = vpop.f32.mrf.mxu3  ;;  %1287 = vmatmul.msk.f32.gmra.mxu3 %vm109_vm0, %v789_v25  ;;  %1303 = vmatmul.msk.f32.gmra.mxu0 %vm109_vm0, %v789_v25  ;;  %v652_v61 = vmul.f32 %v1934_v24, %v651_v37  ;;  %vm668_vm7 = vmor %vm666_vm6, %vm667_vm3 }
 0x236   :  { %v1021_v39 = vadd.f32 %v1020_v38, %v1932_v23  ;;  %v893_v62 = vpop.f32.mrf.mxu1  ;;  %v511_v31 = vpop.xlane.xlu2 %510  ;;  %v662_v36 = vmul.f32 %v1937_v28, %v661_v20 }
 0x237   :  { %v739_v46 = vmul.f32 %v1750_v3, %v719_v59  ;;  %1134 = vst [vmem:[%s2285_s7 + $0x8] sm:$0xff] %v956_v45  ;;  %v894_v41 = vadd.f32 %v893_v62, %v1907_v16  ;;  %v1088_v47 = vpop.f32.mrf.mxu0  ;;  %v531_v60 = vmul.f32 %v511_v31, %v1557_v4  ;;  %v653_v17 = vmul.f32 0.5, %v652_v61 }
 0x238   :  { %1135 = vst [vmem:[%s2285_s7 + $0x10] sm:$0xff] %v1021_v39  ;;  %v1089_v48 = vadd.f32 %v1088_v47, %v1912_v49  ;;  %v663_v53 = vmul.f32 0.5, %v662_v36 }
 0x239   :  { %v1387_v58 = vpop.eup %1386  ;;  %v759_v52 = vadd.f32 %v1759_v9, %v739_v46  ;;  %1137 = vst [vmem:[%s2285_s7 + $0x20] sm:$0xff] %v894_v41  ;;  %v1967_v33 = vadd.f32 1e-05, %v531_v60  ;;  %v654_v2 = vsub.f32 1.5, %v653_v17 }
 0x23a   :  { %v671_v34 = vmul.f32 %v1387_v58, %v1924_v54  ;;  %1140 = vst [vmem:[%s2285_s7 + $0x38] sm:$0xff] %v1089_v48  ;;  %v664_v57 = vsub.f32 1.5, %v663_v53  ;;  %vm677_vm8 = vweird.f32 %v1387_v58 }
 0x23b   :  { %775 = vst.msk [vmem:[#allocation2 + $0x48] sm:$0xff] %vm109_vm0, %v759_v52  ;;  %1388 = vrsqrt.f32 %v1967_v33  ;;  %v790_v63 = vld [vmem:[#allocation2 + $0x40] sm:$0xff]  ;;  %v655_v0 = vmul.f32 %v1934_v24, %v654_v2  ;;  %vm678_vm10 = vmor %vm676_vm9, %vm677_vm8  ;;  %vm686_vm12 = vweird.f32 %v1967_v33 }
 0x23c   :  { %v672_v50 = vmul.f32 %v1387_v58, %v671_v34  ;;  %1256 = vmatmul.msk.f32.gmra.mxu1 %vm109_vm0, %v790_v63  ;;  %v958_v42 = vpop.f32.mrf.mxu2  ;;  %1272 = vmatmul.msk.f32.gmra.mxu2 %vm109_vm0, %v790_v63  ;;  %v665_v1 = vmul.f32 %v1937_v28, %v664_v57 }
 0x23d   :  { %v959_v56 = vadd.f32 %v958_v42, %v1926_v55  ;;  %v1023_v5 = vpop.f32.mrf.mxu3  ;;  %1288 = vmatmul.msk.f32.gmra.mxu3 %vm109_vm0, %v790_v63  ;;  %1304 = vmatmul.msk.f32.gmra.mxu0 %vm109_vm0, %v790_v63  ;;  %v659_v30 = vsel %vm658_vm5, %v1934_v24, %v655_v0 }
 0x23e   :  { %v673_v51 = vmul.f32 0.5, %v672_v50  ;;  %v1024_v27 = vadd.f32 %v1023_v5, %v1932_v23  ;;  %v896_v10 = vpop.f32.mrf.mxu1  ;;  %v720_v11 = vmul.f32 %v659_v30, %v1795_v32  ;;  %v669_v7 = vsel %vm668_vm7, %v1937_v28, %v665_v1 }
 0x23f   :  { %1138 = vst [vmem:[%s2285_s7 + $0x28] sm:$0xff] %v959_v56  ;;  %v897_v12 = vadd.f32 %v896_v10, %v1907_v16  ;;  %v1091_v6 = vpop.f32.mrf.mxu0  ;;  %v721_v14 = vmul.f32 %v669_v7, %v1804_v35 }
 0x240   :  { %v674_v43 = vsub.f32 1.5, %v673_v51  ;;  %1139 = vst [vmem:[%s2285_s7 + $0x30] sm:$0xff] %v1024_v27  ;;  %v1092_v15 = vadd.f32 %v1091_v6, %v1912_v49  ;;  %v740_v18 = vmul.f32 %v1750_v3, %v720_v11 }
 0x241   :  { %v1389_v32 = vpop.eup %1388  ;;  %1141 = vst [vmem:[%s2285_s7 + $0x40] sm:$0xff] %v897_v12  ;;  %v741_v19 = vmul.f32 %v1750_v3, %v721_v14 }
 0x242   :  { %v675_v21 = vmul.f32 %v1387_v58, %v674_v43  ;;  %v681_v35 = vmul.f32 %v1389_v32, %v1967_v33  ;;  %1144 = vst [vmem:[%s2285_s7 + $0x58] sm:$0xff] %v1092_v15  ;;  %v791_v22 = vld [vmem:[#allocation2 + $0x48] sm:$0xff]  ;;  %v760_v24 = vadd.f32 %v1759_v9, %v740_v18  ;;  %vm687_vm11 = vweird.f32 %v1389_v32 }
 0x243   :  { %v761_v25 = vadd.f32 %v1759_v9, %v741_v19  ;;  %vm688_vm13 = vmor %vm686_vm12, %vm687_vm11 }
 0x244   :  { %v679_v28 = vsel %vm678_vm10, %v1387_v58, %v675_v21  ;;  %v682_v29 = vmul.f32 %v1389_v32, %v681_v35  ;;  %1257 = vmatmul.msk.f32.gmra.mxu1 %vm109_vm0, %v791_v22  ;;  %v961_v37 = vpop.f32.mrf.mxu2  ;;  %1273 = vmatmul.msk.f32.gmra.mxu2 %vm109_vm0, %v791_v22  ;;  %776 = vst.msk [vmem:[#allocation2 + $0x50] sm:$0xff] %vm109_vm0, %v760_v24 }
 0x245   :  { %v722_v54 = vmul.f32 %v679_v28, %v1822_v26  ;;  %v962_v8 = vadd.f32 %v961_v37, %v1926_v55  ;;  %v1026_v59 = vpop.f32.mrf.mxu3  ;;  %1289 = vmatmul.msk.f32.gmra.mxu3 %vm109_vm0, %v791_v22  ;;  %1305 = vmatmul.msk.f32.gmra.mxu0 %vm109_vm0, %v791_v22  ;;  %777 = vst.msk [vmem:[#allocation2 + $0x58] sm:$0xff] %vm109_vm0, %v761_v25 }
 0x246   :  { %v683_v20 = vmul.f32 0.5, %v682_v29  ;;  %v1027_v45 = vadd.f32 %v1026_v59, %v1932_v23  ;;  %v899_v38 = vpop.f32.mrf.mxu1 }
 0x247   :  { %v742_v61 = vmul.f32 %v1750_v3, %v722_v54  ;;  %1142 = vst [vmem:[%s2285_s7 + $0x48] sm:$0xff] %v962_v8  ;;  %v900_v26 = vadd.f32 %v899_v38, %v1907_v16  ;;  %v1094_v39 = vpop.f32.mrf.mxu0 }
 0x248   :  { %v684_v62 = vsub.f32 1.5, %v683_v20  ;;  %1143 = vst [vmem:[%s2285_s7 + $0x50] sm:$0xff] %v1027_v45  ;;  %v1095_v31 = vadd.f32 %v1094_v39, %v1912_v49 }
 0x249   :  { %v762_v46 = vadd.f32 %v1759_v9, %v742_v61  ;;  %1145 = vst [vmem:[%s2285_s7 + $0x60] sm:$0xff] %v900_v26 }
 0x24a   :  { %v685_v36 = vmul.f32 %v1389_v32, %v684_v62  ;;  %1148 = vst [vmem:[%s2285_s7 + $0x78] sm:$0xff] %v1095_v31 }
 0x24b   :  { %778 = vst.msk [vmem:[#allocation2 + $0x60] sm:$0xff] %vm109_vm0, %v762_v46  ;;  %v792_v47 = vld [vmem:[#allocation2 + $0x50] sm:$0xff] }
 0x24c   :  { %v689_v41 = vsel %vm688_vm13, %v1389_v32, %v685_v36  ;;  %v964_v60 = vpop.f32.mrf.mxu2  ;;  %1258 = vmatmul.msk.f32.gmra.mxu1 %vm109_vm0, %v792_v47  ;;  %1274 = vmatmul.msk.f32.gmra.mxu2 %vm109_vm0, %v792_v47  ;;  %v793_v63 = vld [vmem:[#allocation2 + $0x58] sm:$0xff] }
 0x24d   :  { %v723_v17 = vmul.f32 %v689_v41, %v1843_v40  ;;  %v965_v48 = vadd.f32 %v964_v60, %v1926_v55  ;;  %v1029_v58 = vpop.f32.mrf.mxu3  ;;  %1290 = vmatmul.msk.f32.gmra.mxu3 %vm109_vm0, %v792_v47  ;;  %1306 = vmatmul.msk.f32.gmra.mxu0 %vm109_vm0, %v792_v47 }
 0x24e   :  { %v1030_v52 = vadd.f32 %v1029_v58, %v1932_v23  ;;  %v902_v53 = vpop.f32.mrf.mxu1 }
 0x24f   :  { %v743_v33 = vmul.f32 %v1750_v3, %v723_v17  ;;  %1146 = vst [vmem:[%s2285_s7 + $0x68] sm:$0xff] %v965_v48  ;;  %v903_v40 = vadd.f32 %v902_v53, %v1907_v16  ;;  %v1097_v2 = vpop.f32.mrf.mxu0 }
 0x250   :  { %1147 = vst [vmem:[%s2285_s7 + $0x70] sm:$0xff] %v1030_v52  ;;  %v1098_v34 = vadd.f32 %v1097_v2, %v1912_v49 }
 0x251   :  { %v763_v57 = vadd.f32 %v1759_v9, %v743_v33  ;;  %1149 = vst [vmem:[%s2285_s7 + $0x80] sm:$0xff] %v903_v40 }
 0x252   :  { %1152 = vst [vmem:[%s2285_s7 + $0x98] sm:$0xff] %v1098_v34  ;;  %v794_v27 = vld [vmem:[#allocation2 + $0x60] sm:$0xff] }
 0x253   :  { %779 = vst.msk [vmem:[#allocation2 + $0x68] sm:$0xff] %vm109_vm0, %v763_v57 }
 0x254   :  { %v967_v0 = vpop.f32.mrf.mxu2  ;;  %1259 = vmatmul.msk.f32.gmra.mxu1 %vm109_vm0, %v793_v63  ;;  %1275 = vmatmul.msk.f32.gmra.mxu2 %vm109_vm0, %v793_v63 }
 0x255   :  { %v968_v50 = vadd.f32 %v967_v0, %v1926_v55  ;;  %v1032_v42 = vpop.f32.mrf.mxu3  ;;  %1291 = vmatmul.msk.f32.gmra.mxu3 %vm109_vm0, %v793_v63  ;;  %1307 = vmatmul.msk.f32.gmra.mxu0 %vm109_vm0, %v793_v63 }
 0x256   :  { %v1033_v1 = vadd.f32 %v1032_v42, %v1932_v23  ;;  %v905_v56 = vpop.f32.mrf.mxu1 }
 0x257   :  { %1150 = vst [vmem:[%s2285_s7 + $0x88] sm:$0xff] %v968_v50  ;;  %v906_v5 = vadd.f32 %v905_v56, %v1907_v16  ;;  %v1100_v30 = vpop.f32.mrf.mxu0 }
 0x258   :  { %1151 = vst [vmem:[%s2285_s7 + $0x90] sm:$0xff] %v1033_v1  ;;  %v1101_v51 = vadd.f32 %v1100_v30, %v1912_v49 }
 0x259   :  { %1153 = vst [vmem:[%s2285_s7 + $0xa0] sm:$0xff] %v906_v5 }
 0x25a   :  { %1156 = vst [vmem:[%s2285_s7 + $0xb8] sm:$0xff] %v1101_v51  ;;  %v795_v32 = vld [vmem:[#allocation2 + $0x68] sm:$0xff] }
 0x25c   :  { %v970_v10 = vpop.f32.mrf.mxu2  ;;  %1260 = vmatmul.msk.f32.gmra.mxu1 %vm109_vm0, %v794_v27  ;;  %1276 = vmatmul.msk.f32.gmra.mxu2 %vm109_vm0, %v794_v27 }
 0x25d   :  { %v971_v11 = vadd.f32 %v970_v10, %v1926_v55  ;;  %v1035_v7 = vpop.f32.mrf.mxu3  ;;  %1292 = vmatmul.msk.f32.gmra.mxu3 %vm109_vm0, %v794_v27  ;;  %1308 = vmatmul.msk.f32.gmra.mxu0 %vm109_vm0, %v794_v27 }
 0x25e   :  { %v1036_v12 = vadd.f32 %v1035_v7, %v1932_v23  ;;  %v908_v6 = vpop.f32.mrf.mxu1 }
 0x25f   :  { %1154 = vst [vmem:[%s2285_s7 + $0xa8] sm:$0xff] %v971_v11  ;;  %v909_v14 = vadd.f32 %v908_v6, %v1907_v16  ;;  %v1103_v43 = vpop.f32.mrf.mxu0 }
 0x260   :  { %1155 = vst [vmem:[%s2285_s7 + $0xb0] sm:$0xff] %v1036_v12  ;;  %v1104_v15 = vadd.f32 %v1103_v43, %v1912_v49 }
 0x261   :  { %1157 = vst [vmem:[%s2285_s7 + $0xc0] sm:$0xff] %v909_v14 }
 0x262   :  { %1160 = vst [vmem:[%s2285_s7 + $0xd8] sm:$0xff] %v1104_v15 }
 0x264   :  { %v973_v18 = vpop.f32.mrf.mxu2  ;;  %1261 = vmatmul.msk.f32.gmra.mxu1 %vm109_vm0, %v795_v32  ;;  %1277 = vmatmul.msk.f32.gmra.mxu2 %vm109_vm0, %v795_v32 }
 0x265   :  { %v974_v19 = vadd.f32 %v973_v18, %v1926_v55  ;;  %v1038_v21 = vpop.f32.mrf.mxu3  ;;  %1293 = vmatmul.msk.f32.gmra.mxu3 %vm109_vm0, %v795_v32  ;;  %1309 = vmatmul.msk.f32.gmra.mxu0 %vm109_vm0, %v795_v32 }
 0x266   :  { %v1039_v35 = vadd.f32 %v1038_v21, %v1932_v23 }
 0x267   :  { %1158 = vst [vmem:[%s2285_s7 + $0xc8] sm:$0xff] %v974_v19 }
 0x268   :  { %1159 = vst [vmem:[%s2285_s7 + $0xd0] sm:$0xff] %v1039_v35 }
 0x292   :  { %v514_v22 = vpop.xlane.xlu0 %513 }
 0x293   :  { %v532_v24 = vmul.f32 %v514_v22, %v1557_v4 }
 0x295   :  { %v548_v25 = vadd.f32 1e-05, %v532_v24 }
 0x297   :  { %1390 = vrsqrt.f32 %v548_v25  ;;  %vm696_vm15 = vweird.f32 %v548_v25 }
 0x29a   :  { %v517_v28 = vpop.xlane.xlu1 %516 }
 0x29b   :  { %v533_v29 = vmul.f32 %v517_v28, %v1557_v4 }
 0x29d   :  { %v1391_v37 = vpop.eup %1390  ;;  %v549_v54 = vadd.f32 1e-05, %v533_v29 }
 0x29e   :  { %v691_v8 = vmul.f32 %v1391_v37, %v548_v25  ;;  %vm697_vm14 = vweird.f32 %v1391_v37 }
 0x29f   :  { %1392 = vrsqrt.f32 %v549_v54  ;;  %vm698_vm1 = vmor %vm696_vm15, %vm697_vm14  ;;  %vm706_vm3 = vweird.f32 %v549_v54 }
 0x2a0   :  { %v692_v59 = vmul.f32 %v1391_v37, %v691_v8 }
 0x2a2   :  { %v693_v20 = vmul.f32 0.5, %v692_v59 }
 0x2a4   :  { %v694_v45 = vsub.f32 1.5, %v693_v20 }
 0x2a5   :  { %v1393_v38 = vpop.eup %1392 }
 0x2a6   :  { %v695_v61 = vmul.f32 %v1391_v37, %v694_v45  ;;  %v701_v26 = vmul.f32 %v1393_v38, %v549_v54  ;;  %vm707_vm2 = vweird.f32 %v1393_v38 }
 0x2a7   :  { %vm708_vm4 = vmor %vm706_vm3, %vm707_vm2 }
 0x2a8   :  { %v699_v39 = vsel %vm698_vm1, %v1391_v37, %v695_v61  ;;  %v702_v62 = vmul.f32 %v1393_v38, %v701_v26 }
 0x2a9   :  { %v724_v31 = vmul.f32 %v699_v39, %v1884_v13 }
 0x2aa   :  { %v703_v46 = vmul.f32 0.5, %v702_v62 }
 0x2ab   :  { %v744_v4 = vmul.f32 %v1750_v3, %v724_v31 }
 0x2ac   :  { %v704_v36 = vsub.f32 1.5, %v703_v46 }
 0x2ad   :  { %v764_v41 = vadd.f32 %v1759_v9, %v744_v4 }
 0x2ae   :  { %v705_v47 = vmul.f32 %v1393_v38, %v704_v36 }
 0x2af   :  { %780 = vst.msk [vmem:[#allocation2 + $0x70] sm:$0xff] %vm109_vm0, %v764_v41 }
 0x2b0   :  { %v709_v60 = vsel %vm708_vm4, %v1393_v38, %v705_v47 }
 0x2b1   :  { %v725_v17 = vmul.f32 %v709_v60, %v1892_v44  ;;  %v911_v48 = vpop.f32.mrf.mxu1 }
 0x2b2   :  { %v912_v58 = vadd.f32 %v911_v48, %v1907_v16  ;;  %v1106_v52 = vpop.f32.mrf.mxu0 }
 0x2b3   :  { %v745_v13 = vmul.f32 %v1750_v3, %v725_v17  ;;  %v1107_v53 = vadd.f32 %v1106_v52, %v1912_v49 }
 0x2b4   :  { %1161 = vst [vmem:[%s2285_s7 + $0xe0] sm:$0xff] %v912_v58 }
 0x2b5   :  { %v765_v33 = vadd.f32 %v1759_v9, %v745_v13  ;;  %1164 = vst [vmem:[%s2285_s7 + $0xf8] sm:$0xff] %v1107_v53 }
 0x2b6   :  { %v796_v40 = vld [vmem:[#allocation2 + $0x70] sm:$0xff] }
 0x2b7   :  { %781 = vst.msk [vmem:[#allocation2 + $0x78] sm:$0xff] %vm109_vm0, %v765_v33  ;;  %1262 = vmatmul.msk.f32.gmra.mxu1 %vm109_vm0, %v796_v40  ;;  %v976_v44 = vpop.f32.mrf.mxu2  ;;  %1278 = vmatmul.msk.f32.gmra.mxu2 %vm109_vm0, %v796_v40 }
 0x2b8   :  { %v977_v3 = vadd.f32 %v976_v44, %v1926_v55  ;;  %v1041_v2 = vpop.f32.mrf.mxu3  ;;  %1294 = vmatmul.msk.f32.gmra.mxu3 %vm109_vm0, %v796_v40  ;;  %1310 = vmatmul.msk.f32.gmra.mxu0 %vm109_vm0, %v796_v40 }
 0x2b9   :  { %v1042_v9 = vadd.f32 %v1041_v2, %v1932_v23  ;;  %v914_v34 = vpop.f32.mrf.mxu1 }
 0x2ba   :  { %1162 = vst [vmem:[%s2285_s7 + $0xe8] sm:$0xff] %v977_v3  ;;  %v915_v57 = vadd.f32 %v914_v34, %v1907_v16  ;;  %v1109_v63 = vpop.f32.mrf.mxu0 }
 0x2bb   :  { %1163 = vst [vmem:[%s2285_s7 + $0xf0] sm:$0xff] %v1042_v9  ;;  %v1110_v0 = vadd.f32 %v1109_v63, %v1912_v49 }
 0x2bc   :  { %1165 = vst [vmem:[%s2285_s7 + $0x100] sm:$0xff] %v915_v57 }
 0x2bd   :  { %1168 = vst [vmem:[%s2285_s7 + $0x118] sm:$0xff] %v1110_v0 }
 0x2be   :  { %v797_v50 = vld [vmem:[#allocation2 + $0x78] sm:$0xff] }
 0x2bf   :  { %1263 = vmatmul.msk.f32.gmra.mxu1 %vm109_vm0, %v797_v50  ;;  %v979_v42 = vpop.f32.mrf.mxu2  ;;  %1279 = vmatmul.msk.f32.gmra.mxu2 %vm109_vm0, %v797_v50 }
 0x2c0   :  { %v980_v1 = vadd.f32 %v979_v42, %v1926_v55  ;;  %v1044_v56 = vpop.f32.mrf.mxu3  ;;  %1295 = vmatmul.msk.f32.gmra.mxu3 %vm109_vm0, %v797_v50  ;;  %1311 = vmatmul.msk.f32.gmra.mxu0 %vm109_vm0, %v797_v50 }
 0x2c1   :  { %v1045_v5 = vadd.f32 %v1044_v56, %v1932_v23  ;;  %v917_v30 = vpop.f32.mrf.mxu1 }
 0x2c2   :  { %1166 = vst [vmem:[%s2285_s7 + $0x108] sm:$0xff] %v980_v1  ;;  %v918_v51 = vadd.f32 %v917_v30, %v1907_v16  ;;  %v1112_v27 = vpop.f32.mrf.mxu0 }
 0x2c3   :  { %1167 = vst [vmem:[%s2285_s7 + $0x110] sm:$0xff] %v1045_v5  ;;  %v1113_v10 = vadd.f32 %v1112_v27, %v1912_v49 }
 0x2c4   :  { %1169 = vst [vmem:[%s2285_s7 + $0x120] sm:$0xff] %v918_v51 }
 0x2c5   :  { %1172 = vst [vmem:[%s2285_s7 + $0x138] sm:$0xff] %v1113_v10 }
 0x2c7   :  { %v982_v11 = vpop.f32.mrf.mxu2 }
 0x2c8   :  { %v983_v7 = vadd.f32 %v982_v11, %v1926_v55  ;;  %v1047_v12 = vpop.f32.mrf.mxu3 }
 0x2c9   :  { %v1048_v6 = vadd.f32 %v1047_v12, %v1932_v23  ;;  %v920_v14 = vpop.f32.mrf.mxu1 }
 0x2ca   :  { %1170 = vst [vmem:[%s2285_s7 + $0x128] sm:$0xff] %v983_v7  ;;  %v921_v43 = vadd.f32 %v920_v14, %v1907_v16  ;;  %v1115_v15 = vpop.f32.mrf.mxu0 }
 0x2cb   :  { %1171 = vst [vmem:[%s2285_s7 + $0x130] sm:$0xff] %v1048_v6  ;;  %v1116_v32 = vadd.f32 %v1115_v15, %v1912_v49 }
 0x2cc   :  { %1173 = vst [vmem:[%s2285_s7 + $0x140] sm:$0xff] %v921_v43 }
 0x2cd   :  { %1176 = vst [vmem:[%s2285_s7 + $0x158] sm:$0xff] %v1116_v32 }
 0x2cf   :  { %v985_v18 = vpop.f32.mrf.mxu2 }
 0x2d0   :  { %v986_v19 = vadd.f32 %v985_v18, %v1926_v55  ;;  %v1050_v21 = vpop.f32.mrf.mxu3 }
 0x2d1   :  { %v1051_v35 = vadd.f32 %v1050_v21, %v1932_v23  ;;  %v923_v22 = vpop.f32.mrf.mxu1 }
 0x2d2   :  { %1174 = vst [vmem:[%s2285_s7 + $0x148] sm:$0xff] %v986_v19  ;;  %v924_v24 = vadd.f32 %v923_v22, %v1907_v16  ;;  %v1118_v25 = vpop.f32.mrf.mxu0 }
 0x2d3   :  { %1175 = vst [vmem:[%s2285_s7 + $0x150] sm:$0xff] %v1051_v35  ;;  %v1119_v28 = vadd.f32 %v1118_v25, %v1912_v49 }
 0x2d4   :  { %1177 = vst [vmem:[%s2285_s7 + $0x160] sm:$0xff] %v924_v24 }
 0x2d5   :  { %1180 = vst [vmem:[%s2285_s7 + $0x178] sm:$0xff] %v1119_v28 }
 0x2d7   :  { %v988_v29 = vpop.f32.mrf.mxu2 }
 0x2d8   :  { %v989_v37 = vadd.f32 %v988_v29, %v1926_v55  ;;  %v1053_v54 = vpop.f32.mrf.mxu3 }
 0x2d9   :  { %v1054_v8 = vadd.f32 %v1053_v54, %v1932_v23  ;;  %v926_v59 = vpop.f32.mrf.mxu1 }
 0x2da   :  { %1178 = vst [vmem:[%s2285_s7 + $0x168] sm:$0xff] %v989_v37  ;;  %v927_v20 = vadd.f32 %v926_v59, %v1907_v16  ;;  %v1121_v45 = vpop.f32.mrf.mxu0 }
 0x2db   :  { %1179 = vst [vmem:[%s2285_s7 + $0x170] sm:$0xff] %v1054_v8  ;;  %v1122_v38 = vadd.f32 %v1121_v45, %v1912_v49 }
 0x2dc   :  { %1181 = vst [vmem:[%s2285_s7 + $0x180] sm:$0xff] %v927_v20 }
 0x2dd   :  { %1184 = vst [vmem:[%s2285_s7 + $0x198] sm:$0xff] %v1122_v38 }
 0x2df   :  { %v991_v61 = vpop.f32.mrf.mxu2 }
 0x2e0   :  { %v992_v26 = vadd.f32 %v991_v61, %v1926_v55  ;;  %v1056_v39 = vpop.f32.mrf.mxu3 }
 0x2e1   :  { %v1057_v62 = vadd.f32 %v1056_v39, %v1932_v23  ;;  %v929_v31 = vpop.f32.mrf.mxu1 }
 0x2e2   :  { %1182 = vst [vmem:[%s2285_s7 + $0x188] sm:$0xff] %v992_v26  ;;  %v930_v46 = vadd.f32 %v929_v31, %v1907_v16  ;;  %v1124_v4 = vpop.f32.mrf.mxu0 }
 0x2e3   :  { %1183 = vst [vmem:[%s2285_s7 + $0x190] sm:$0xff] %v1057_v62  ;;  %v1125_v36 = vadd.f32 %v1124_v4, %v1912_v49 }
 0x2e4   :  { %1185 = vst [vmem:[%s2285_s7 + $0x1a0] sm:$0xff] %v930_v46 }
 0x2e5   :  { %1188 = vst [vmem:[%s2285_s7 + $0x1b8] sm:$0xff] %v1125_v36 }
 0x2e7   :  { %v994_v41 = vpop.f32.mrf.mxu2 }
 0x2e8   :  { %v995_v47 = vadd.f32 %v994_v41, %v1926_v55  ;;  %v1059_v60 = vpop.f32.mrf.mxu3 }
 0x2e9   :  { %v1060_v17 = vadd.f32 %v1059_v60, %v1932_v23 }
 0x2ea   :  { %1186 = vst [vmem:[%s2285_s7 + $0x1a8] sm:$0xff] %v995_v47 }
 0x2eb   :  { %1187 = vst [vmem:[%s2285_s7 + $0x1b0] sm:$0xff] %v1060_v17 }
 0x334   :  { %v932_v48 = vpop.f32.mrf.mxu1 }
 0x335   :  { %v933_v58 = vadd.f32 %v932_v48, %v1907_v16  ;;  %v1127_v52 = vpop.f32.mrf.mxu0 }
 0x336   :  { %v1128_v13 = vadd.f32 %v1127_v52, %v1912_v49 }
 0x337   :  { %1189 = vst [vmem:[%s2285_s7 + $0x1c0] sm:$0xff] %v933_v58 }
 0x338   :  { %1192 = vst [vmem:[%s2285_s7 + $0x1d8] sm:$0xff] %v1128_v13 }
 0x33a   :  { %v997_v53 = vpop.f32.mrf.mxu2 }
 0x33b   :  { %v998_v33 = vadd.f32 %v997_v53, %v1926_v55  ;;  %v1062_v40 = vpop.f32.mrf.mxu3 }
 0x33c   :  { %v1063_v44 = vadd.f32 %v1062_v40, %v1932_v23  ;;  %v935_v3 = vpop.f32.mrf.mxu1 }
 0x33d   :  { %1190 = vst [vmem:[%s2285_s7 + $0x1c8] sm:$0xff] %v998_v33  ;;  %v936_v2 = vadd.f32 %v935_v3, %v1907_v16  ;;  %v1130_v9 = vpop.f32.mrf.mxu0 }
 0x33e   :  { %1191 = vst [vmem:[%s2285_s7 + $0x1d0] sm:$0xff] %v1063_v44  ;;  %v1131_v34 = vadd.f32 %v1130_v9, %v1912_v49 }
 0x33f   :  { %1193 = vst [vmem:[%s2285_s7 + $0x1e0] sm:$0xff] %v936_v2 }
 0x340   :  { %1196 = vst [vmem:[%s2285_s7 + $0x1f8] sm:$0xff] %v1131_v34 }
 0x342   :  { %v1000_v57 = vpop.f32.mrf.mxu2 }
 0x343   :  { %v1001_v63 = vadd.f32 %v1000_v57, %v1926_v55  ;;  %v1065_v0 = vpop.f32.mrf.mxu3 }
 0x344   :  { %v1066_v16 = vadd.f32 %v1065_v0, %v1932_v23 }
 0x345   :  { %1194 = vst [vmem:[%s2285_s7 + $0x1e8] sm:$0xff] %v1001_v63 }
 0x346   :  { %1195 = vst [vmem:[%s2285_s7 + $0x1f0] sm:$0xff] %v1066_v16 }

</bundles_post_ra>
